<compile_context>
chip_gen: v7x
topology: tpu7x:2x2x1
jax: 0.10.0
libtpu: 0.0.40
codegen_flags: <defaults>
</compile_context>

<pallas_src>
import functools

import jax
import jax.numpy as jnp
from jax import lax
from jax.experimental import pallas as pl
from jax.experimental.pallas import tpu as pltpu

LANE = 128
SUBLANE = 8


def _round_up(x, m):
    return ((x + m - 1) // m) * m


# ----------------------------------------------------------------------------
# Exact (erf-based) GELU, matching nn.GELU() default.  The rational erf uses
# mul/add only; the single divide is routed through `recip` so the kernel can
# push it to the EUP (pl.reciprocal) while the references use a true divide.
# ----------------------------------------------------------------------------
def _erf_f32(x, recip):
    alpha = (0.00022905065861350646, 0.0034082910107109506,
             0.050955695062380861, 0.18520832239976145, 1.128379143519084)
    beta = (-1.1791602954361697e-7, 0.000023547966471313185,
            0.0010179625278914885, 0.014070470171167667,
            0.11098505178285362, 0.49746925110067538, 1.0)
    x = jnp.clip(x, -3.832506856900711, 3.832506856900711)
    x2 = x * x
    p = alpha[0]
    for c in alpha[1:]:
        p = p * x2 + c
    q = beta[0]
    for c in beta[1:]:
        q = q * x2 + c
    return (x * p) * recip(q)


def _gelu_exact(x, recip=lambda q: 1.0 / q):
    return 0.5 * x * (1.0 + _erf_f32(x * 0.7071067811865476, recip))


# ----------------------------------------------------------------------------
# Pallas kernel: fused one-hot gather + conv, then Linear/tanh + Linear.
# ----------------------------------------------------------------------------
def pos_tagger_kernel(tok_ref, tbl_ref, b1_ref, w2_ref, b2_ref, w3t_ref,
                      b3t_ref, out_ref, *, window_size, tile_m, vocab_pad):
    tok = tok_ref[...]                                          # (TM+8, 1) i32
    col_ids = lax.broadcasted_iota(jnp.int32, (tile_m, vocab_pad), 1)

    # Fused embedding-gather + ConvEncoder.linear_layer:
    #   acc[m] = sum_k one_hot(tok[m + k]) @ (emb @ W1[k])   (f32 accumulation)
    acc = jnp.zeros((tile_m, b1_ref.shape[1]), jnp.float32)
    for k in range(window_size):
        oh = jnp.where(tok[k:k + tile_m, :] == col_ids, 1.0, 0.0
                       ).astype(jnp.bfloat16)                   # (TM, Vp)
        acc = acc + jnp.dot(oh, tbl_ref[k],
                            preferred_element_type=jnp.float32)
    h = _gelu_exact(acc + b1_ref[...],
                    recip=lambda q: pl.reciprocal(q, approx=True))  # (TM,ENCp)

    # MLP: Linear -> tanh -> Linear.  The final layer is produced transposed
    # (classes on sublanes, sequence on lanes) for a compact lane-dense store.
    z = jnp.tanh(jnp.dot(h.astype(jnp.bfloat16), w2_ref[...],
                         preferred_element_type=jnp.float32) + b2_ref[...])
    logits_t = lax.dot_general(
        w3t_ref[...], z.astype(jnp.bfloat16),
        dimension_numbers=(((1,), (1,)), ((), ())),
        preferred_element_type=jnp.float32) + b3t_ref[...]      # (C16, TM)
    out_ref[...] = logits_t


# ----------------------------------------------------------------------------
# Wrapper: weight folding / padding + token windowing, then one pallas_call.
# ----------------------------------------------------------------------------
@functools.partial(jax.jit, static_argnames=("window_size", "row_tile"))
def pos_tagger_forward(tokens, params, *, window_size=5, row_tile=1024):
    """POSTagger forward (conv encoder). tokens (B, S) int -> (B, S, C) f32."""
    emb = params["emb"]
    w1, b1 = params["w1"], params["b1"]
    w2, b2 = params["w2"], params["b2"]
    w3, b3 = params["w3"], params["b3"]

    B, S = tokens.shape
    V, E = emb.shape
    W = window_size
    half = (W - 1) // 2
    WE, ENC = w1.shape
    H = w2.shape[1]
    C = w3.shape[1]
    assert WE == W * E, (WE, W, E)

    ENCp = _round_up(ENC, LANE)            # 100 -> 128
    Hp = _round_up(H, LANE)                # 32  -> 128
    Cp = _round_up(C, SUBLANE)             # 10  -> 16  (f32 sublane tile)
    Vp = _round_up(V + 1, LANE)            # +1: sentinel id V = zero embedding

    # Sequence tiling: TM output rows per grid step (lane dim of the output).
    TM = max(LANE, min(_round_up(row_tile, LANE), _round_up(S, LANE)))
    S_pad = _round_up(S, TM)
    num_tiles = S_pad // TM
    HALO = SUBLANE                          # >= window_size - 1, sublane-aligned
    TB = TM + HALO

    f32, bf16 = jnp.float32, jnp.bfloat16

    # Fold the embedding into the conv weights:  T[k] = emb_pad @ W1[k].
    # Rows >= V are zero, so the sentinel id V is an exact zero "padding
    # embedding" (same as F.pad on the embeddings). Zero-padding ENC/H/C is
    # exact too (gelu(0)=0, tanh(0)=0, zero weight rows/cols).
    emb_p = jnp.pad(emb.astype(f32), ((0, Vp - V), (0, 0)))           # (Vp, E)
    w1_r = w1.astype(f32).reshape(W, E, ENC)
    tbl = jnp.einsum("ve,wec->wvc", emb_p, w1_r)                      # (W,Vp,ENC)
    tbl = jnp.pad(tbl, ((0, 0), (0, 0), (0, ENCp - ENC))).astype(bf16)

    b1p = jnp.pad(b1.astype(f32), ((0, 0), (0, ENCp - ENC)))          # (1, ENCp)
    w2p = jnp.pad(w2, ((0, ENCp - ENC), (0, Hp - H))).astype(bf16)    # (ENCp, Hp)
    b2p = jnp.pad(b2.astype(f32), ((0, 0), (0, Hp - H)))              # (1, Hp)
    w3t = jnp.pad(w3.T, ((0, Cp - C), (0, Hp - H))).astype(bf16)      # (Cp, Hp)
    b3t = jnp.pad(b3.astype(f32).T, ((0, Cp - C), (0, 0)))            # (Cp, 1)

    # Pre-windowed token IDs, sequence on sublanes: (B*num_tiles, TB, 1).
    # Positions outside [0, S) get the sentinel id -> zero embedding rows.
    D1 = S_pad + HALO
    tok_p = jnp.full((B, D1), V, jnp.int32)
    tok_p = tok_p.at[:, half:half + S].set(tokens.astype(jnp.int32))
    win = jnp.arange(num_tiles)[:, None] * TM + jnp.arange(TB)[None, :]
    tok_tiles = tok_p[:, win].reshape(B * num_tiles, TB, 1)

    kernel = functools.partial(pos_tagger_kernel, window_size=W,
                               tile_m=TM, vocab_pad=Vp)

    out = pl.pallas_call(
        kernel,
        out_shape=jax.ShapeDtypeStruct((B * num_tiles, Cp, TM), f32),
        grid=(B * num_tiles,),
        in_specs=[
            # per-tile token ids: 4 B/position (+32 B halo)
            pl.BlockSpec((pl.Squeezed(), TB, 1), lambda g: (g, 0, 0)),
            # folded conv table + weights/biases: constant index maps ->
            # fetched once and VMEM-resident across the whole grid
            pl.BlockSpec((W, Vp, ENCp), lambda g: (0, 0, 0)),
            pl.BlockSpec((1, ENCp), lambda g: (0, 0)),
            pl.BlockSpec((ENCp, Hp), lambda g: (0, 0)),
            pl.BlockSpec((1, Hp), lambda g: (0, 0)),
            pl.BlockSpec((Cp, Hp), lambda g: (0, 0)),
            pl.BlockSpec((Cp, 1), lambda g: (0, 0)),
        ],
        out_specs=pl.BlockSpec((pl.Squeezed(), Cp, TM), lambda g: (g, 0, 0)),
        compiler_params=pltpu.CompilerParams(
            dimension_semantics=("parallel",),
            vmem_limit_bytes=32 * 1024 * 1024),
    )(tok_tiles, tbl, b1p, w2p, b2p, w3t, b3t)

    # (B*num_tiles, Cp, TM) -> (B, S, C)
    out = out.reshape(B, num_tiles, Cp, TM).transpose(0, 1, 3, 2)
    return out.reshape(B, S_pad, Cp)[:, :S, :C]


# ----------------------------------------------------------------------------
# References for verification
# ----------------------------------------------------------------------------
def pos_tagger_reference_f32(tokens, params, *, window_size=5):
    """Straight f32 translation of the PyTorch forward (semantic ground truth)."""
    emb = params["emb"]
    B, S = tokens.shape
    E = emb.shape[1]
    W = window_size
    half = (W - 1) // 2
    emb_x = jnp.take(emb, tokens, axis=0)
    padded = jnp.pad(emb_x, ((0, 0), (half, half), (0, 0)))
    windows = jnp.stack([padded[:, k:k + S, :] for k in range(W)], axis=2)
    xw = windows.reshape(B, S, W * E)
    h = _gelu_exact(xw @ params["w1"] + params["b1"])
    z = jnp.tanh(h @ params["w2"] + params["b2"])
    return z @ params["w3"] + params["b3"]


def pos_tagger_reference_bf16(tokens, params, *, window_size=5):
    """Mirrors the kernel's folded-table bf16 math (tight numerical check)."""
    emb = params["emb"]
    w1, w2, w3 = params["w1"], params["w2"], params["w3"]
    b1, b2, b3 = params["b1"], params["b2"], params["b3"]
    B, S = tokens.shape
    V, E = emb.shape
    W = window_size
    half = (W - 1) // 2
    ENC = w1.shape[1]
    Vp = _round_up(V + 1, LANE)
    f32, bf16 = jnp.float32, jnp.bfloat16

    emb_p = jnp.pad(emb.astype(f32), ((0, Vp - V), (0, 0)))
    tbl = jnp.einsum("ve,wec->wvc", emb_p,
                     w1.astype(f32).reshape(W, E, ENC)).astype(bf16)
    tok_p = jnp.full((B, S + W - 1), V, jnp.int32)
    tok_p = tok_p.at[:, half:half + S].set(tokens.astype(jnp.int32))

    acc = jnp.zeros((B, S, ENC), f32)
    for k in range(W):
        oh = jax.nn.one_hot(tok_p[:, k:k + S], Vp, dtype=bf16)
        acc = acc + jnp.einsum("bsv,vc->bsc", oh, tbl[k],
                               preferred_element_type=f32)
    h = _gelu_exact(acc + b1.astype(f32))
    z = jnp.tanh(jnp.einsum("bse,eh->bsh", h.astype(bf16), w2.astype(bf16),
                            preferred_element_type=f32) + b2.astype(f32))
    return (jnp.einsum("bsh,hc->bsc", z.astype(bf16), w3.astype(bf16),
                       preferred_element_type=f32) + b3.astype(f32))


if __name__ == "__main__":
    emb_size = 32
    window_size = 5
    encoder_out_dim = 100          # fixed in POSTagger.__init__
    mlp_hidden_size = 32
    output_size = 10               # n_classes
    vocab_size = 50
    pad_idx = 0

    key = jax.random.PRNGKey(0)
    ks = jax.random.split(key, 8)

    emb = 0.1 * jax.random.normal(ks[0], (vocab_size, emb_size), jnp.float32)
    emb = emb.at[pad_idx].set(0.0)                       # padding_idx -> zeros
    w1 = 0.05 * jax.random.normal(ks[1], (window_size * emb_size,
                                          encoder_out_dim), jnp.float32)
    b1 = 0.05 * jax.random.normal(ks[2], (1, encoder_out_dim), jnp.float32)
    w2 = 0.05 * jax.random.normal(ks[3], (encoder_out_dim,
                                          mlp_hidden_size), jnp.float32)
    b2 = 0.05 * jax.random.normal(ks[4], (1, mlp_hidden_size), jnp.float32)
    w3 = 0.05 * jax.random.normal(ks[5], (mlp_hidden_size,
                                          output_size), jnp.float32)
    b3 = 0.05 * jax.random.normal(ks[6], (1, output_size), jnp.float32)
    params = dict(emb=emb, w1=w1, b1=b1, w2=w2, b2=b2, w3=w3, b3=b3)

    def check(tokens, row_tile):
        got = jax.block_until_ready(
            pos_tagger_forward(tokens, params, window_size=window_size,
                               row_tile=row_tile))
        assert got.shape == tokens.shape + (output_size,), got.shape
        assert got.dtype == jnp.float32
        tight = pos_tagger_reference_bf16(tokens, params,
                                          window_size=window_size)
        loose = pos_tagger_reference_f32(tokens, params,
                                         window_size=window_size)
        err_t = float(jnp.max(jnp.abs(got - tight)))
        err_l = float(jnp.max(jnp.abs(got - loose)))
        assert err_t < 5e-4, ("bf16-matched reference mismatch", err_t)
        assert err_l < 1e-2, ("f32 reference mismatch", err_l)

    # Case 1: small shapes consistent with the module (B=2, S=8).
    tok1 = jax.random.randint(ks[7], (2, 8), 0, vocab_size, jnp.int32)
    check(tok1, row_tile=1024)

    # Case 2: multi-tile flattened grid (S=300, TM=128) + halo across tiles.
    tok2 = jax.random.randint(jax.random.PRNGKey(1), (2, 300), 0,
                              vocab_size, jnp.int32)
    check(tok2, row_tile=128)

    print("KERNEL_OK")
</pallas_src>

<mosaic_0001>
module attributes {stable_mosaic.version = 11 : i64} {
  func.func @pos_tagger_kernel(%arg0: i32, %arg1: memref<1x136x1xi32, #tpu.memory_space<vmem>>, %arg2: memref<5x128x128xbf16, #tpu.memory_space<vmem>>, %arg3: memref<1x128xf32, #tpu.memory_space<vmem>>, %arg4: memref<128x128xbf16, #tpu.memory_space<vmem>>, %arg5: memref<1x128xf32, #tpu.memory_space<vmem>>, %arg6: memref<16x128xbf16, #tpu.memory_space<vmem>>, %arg7: memref<16x1xf32, #tpu.memory_space<vmem>>, %arg8: memref<1x16x128xf32, #tpu.memory_space<vmem>>) attributes {dimension_semantics = [#tpu.dimension_semantics<parallel>], iteration_bounds = array<i64: 2>, scalar_prefetch = 0 : i64, scratch_operands = 0 : i64, tpu.core_type = #tpu.core_type<tc>, window_params = [{transform_indices = @transform_0, window_bounds = array<i64: 1, 136, 1>}, {pipeline_mode = #tpu.pipeline_mode<synchronous>, transform_indices = @transform_1, window_bounds = array<i64: 5, 128, 128>}, {pipeline_mode = #tpu.pipeline_mode<synchronous>, transform_indices = @transform_2, window_bounds = array<i64: 1, 128>}, {pipeline_mode = #tpu.pipeline_mode<synchronous>, transform_indices = @transform_3, window_bounds = array<i64: 128, 128>}, {pipeline_mode = #tpu.pipeline_mode<synchronous>, transform_indices = @transform_4, window_bounds = array<i64: 1, 128>}, {pipeline_mode = #tpu.pipeline_mode<synchronous>, transform_indices = @transform_5, window_bounds = array<i64: 16, 128>}, {pipeline_mode = #tpu.pipeline_mode<synchronous>, transform_indices = @transform_6, window_bounds = array<i64: 16, 1>}, {transform_indices = @transform_7, window_bounds = array<i64: 1, 16, 128>}]} {
    %c0 = arith.constant 0 : index
    %c0_0 = arith.constant 0 : index
    %c0_1 = arith.constant 0 : index
    %0 = vector.load %arg1[%c0, %c0_0, %c0_1] : memref<1x136x1xi32, #tpu.memory_space<vmem>>, vector<1x136x1xi32>
    %1 = vector.shape_cast %0 : vector<1x136x1xi32> to vector<136x1xi32>
    %2 = tpu.iota {dimensions = array<i32: 1>} : vector<128x128xi32>
    %cst = arith.constant 0.000000e+00 : f32
    %3 = vector.broadcast %cst : f32 to vector<128x128xf32>
    %4 = vector.extract_strided_slice %1 {offsets = [0, 0], sizes = [128, 1], strides = [1, 1]} : vector<136x1xi32> to vector<128x1xi32>
    %5 = vector.broadcast %4 : vector<128x1xi32> to vector<128x128xi32>
    %6 = arith.cmpi eq, %5, %2 : vector<128x128xi32>
    %cst_2 = arith.constant 1.000000e+00 : f32
    %cst_3 = arith.constant 0.000000e+00 : f32
    %7 = vector.broadcast %cst_2 : f32 to vector<128x128xf32>
    %8 = vector.broadcast %cst_3 : f32 to vector<128x128xf32>
    %9 = arith.select %6, %7, %8 : vector<128x128xi1>, vector<128x128xf32>
    %10 = arith.truncf %9 : vector<128x128xf32> to vector<128x128xbf16>
    %c0_4 = arith.constant 0 : index
    %c0_5 = arith.constant 0 : index
    %c0_6 = arith.constant 0 : index
    %11 = vector.load %arg2[%c0_4, %c0_5, %c0_6] : memref<5x128x128xbf16, #tpu.memory_space<vmem>>, vector<1x128x128xbf16>
    %12 = vector.shape_cast %11 : vector<1x128x128xbf16> to vector<128x128xbf16>
    %cst_7 = arith.constant dense<0.000000e+00> : vector<128x128xf32>
    %13 = tpu.matmul %10, %12, %cst_7 {dimension_numbers = #tpu.dot_dimension_numbers<[1], [0], [0], [1], [0, 0, 1, 1], [], []>} : vector<128x128xbf16>, vector<128x128xbf16>, vector<128x128xf32> -> vector<128x128xf32>
    %14 = arith.addf %3, %13 : vector<128x128xf32>
    %15 = vector.extract_strided_slice %1 {offsets = [1, 0], sizes = [128, 1], strides = [1, 1]} : vector<136x1xi32> to vector<128x1xi32>
    %16 = vector.broadcast %15 : vector<128x1xi32> to vector<128x128xi32>
    %17 = arith.cmpi eq, %16, %2 : vector<128x128xi32>
    %cst_8 = arith.constant 1.000000e+00 : f32
    %cst_9 = arith.constant 0.000000e+00 : f32
    %18 = vector.broadcast %cst_8 : f32 to vector<128x128xf32>
    %19 = vector.broadcast %cst_9 : f32 to vector<128x128xf32>
    %20 = arith.select %17, %18, %19 : vector<128x128xi1>, vector<128x128xf32>
    %21 = arith.truncf %20 : vector<128x128xf32> to vector<128x128xbf16>
    %c1 = arith.constant 1 : index
    %c0_10 = arith.constant 0 : index
    %c0_11 = arith.constant 0 : index
    %22 = vector.load %arg2[%c1, %c0_10, %c0_11] : memref<5x128x128xbf16, #tpu.memory_space<vmem>>, vector<1x128x128xbf16>
    %23 = vector.shape_cast %22 : vector<1x128x128xbf16> to vector<128x128xbf16>
    %cst_12 = arith.constant dense<0.000000e+00> : vector<128x128xf32>
    %24 = tpu.matmul %21, %23, %cst_12 {dimension_numbers = #tpu.dot_dimension_numbers<[1], [0], [0], [1], [0, 0, 1, 1], [], []>} : vector<128x128xbf16>, vector<128x128xbf16>, vector<128x128xf32> -> vector<128x128xf32>
    %25 = arith.addf %14, %24 : vector<128x128xf32>
    %26 = vector.extract_strided_slice %1 {offsets = [2, 0], sizes = [128, 1], strides = [1, 1]} : vector<136x1xi32> to vector<128x1xi32>
    %27 = vector.broadcast %26 : vector<128x1xi32> to vector<128x128xi32>
    %28 = arith.cmpi eq, %27, %2 : vector<128x128xi32>
    %cst_13 = arith.constant 1.000000e+00 : f32
    %cst_14 = arith.constant 0.000000e+00 : f32
    %29 = vector.broadcast %cst_13 : f32 to vector<128x128xf32>
    %30 = vector.broadcast %cst_14 : f32 to vector<128x128xf32>
    %31 = arith.select %28, %29, %30 : vector<128x128xi1>, vector<128x128xf32>
    %32 = arith.truncf %31 : vector<128x128xf32> to vector<128x128xbf16>
    %c2 = arith.constant 2 : index
    %c0_15 = arith.constant 0 : index
    %c0_16 = arith.constant 0 : index
    %33 = vector.load %arg2[%c2, %c0_15, %c0_16] : memref<5x128x128xbf16, #tpu.memory_space<vmem>>, vector<1x128x128xbf16>
    %34 = vector.shape_cast %33 : vector<1x128x128xbf16> to vector<128x128xbf16>
    %cst_17 = arith.constant dense<0.000000e+00> : vector<128x128xf32>
    %35 = tpu.matmul %32, %34, %cst_17 {dimension_numbers = #tpu.dot_dimension_numbers<[1], [0], [0], [1], [0, 0, 1, 1], [], []>} : vector<128x128xbf16>, vector<128x128xbf16>, vector<128x128xf32> -> vector<128x128xf32>
    %36 = arith.addf %25, %35 : vector<128x128xf32>
    %37 = vector.extract_strided_slice %1 {offsets = [3, 0], sizes = [128, 1], strides = [1, 1]} : vector<136x1xi32> to vector<128x1xi32>
    %38 = vector.broadcast %37 : vector<128x1xi32> to vector<128x128xi32>
    %39 = arith.cmpi eq, %38, %2 : vector<128x128xi32>
    %cst_18 = arith.constant 1.000000e+00 : f32
    %cst_19 = arith.constant 0.000000e+00 : f32
    %40 = vector.broadcast %cst_18 : f32 to vector<128x128xf32>
    %41 = vector.broadcast %cst_19 : f32 to vector<128x128xf32>
    %42 = arith.select %39, %40, %41 : vector<128x128xi1>, vector<128x128xf32>
    %43 = arith.truncf %42 : vector<128x128xf32> to vector<128x128xbf16>
    %c3 = arith.constant 3 : index
    %c0_20 = arith.constant 0 : index
    %c0_21 = arith.constant 0 : index
    %44 = vector.load %arg2[%c3, %c0_20, %c0_21] : memref<5x128x128xbf16, #tpu.memory_space<vmem>>, vector<1x128x128xbf16>
    %45 = vector.shape_cast %44 : vector<1x128x128xbf16> to vector<128x128xbf16>
    %cst_22 = arith.constant dense<0.000000e+00> : vector<128x128xf32>
    %46 = tpu.matmul %43, %45, %cst_22 {dimension_numbers = #tpu.dot_dimension_numbers<[1], [0], [0], [1], [0, 0, 1, 1], [], []>} : vector<128x128xbf16>, vector<128x128xbf16>, vector<128x128xf32> -> vector<128x128xf32>
    %47 = arith.addf %36, %46 : vector<128x128xf32>
    %48 = vector.extract_strided_slice %1 {offsets = [4, 0], sizes = [128, 1], strides = [1, 1]} : vector<136x1xi32> to vector<128x1xi32>
    %49 = vector.broadcast %48 : vector<128x1xi32> to vector<128x128xi32>
    %50 = arith.cmpi eq, %49, %2 : vector<128x128xi32>
    %cst_23 = arith.constant 1.000000e+00 : f32
    %cst_24 = arith.constant 0.000000e+00 : f32
    %51 = vector.broadcast %cst_23 : f32 to vector<128x128xf32>
    %52 = vector.broadcast %cst_24 : f32 to vector<128x128xf32>
    %53 = arith.select %50, %51, %52 : vector<128x128xi1>, vector<128x128xf32>
    %54 = arith.truncf %53 : vector<128x128xf32> to vector<128x128xbf16>
    %c4 = arith.constant 4 : index
    %c0_25 = arith.constant 0 : index
    %c0_26 = arith.constant 0 : index
    %55 = vector.load %arg2[%c4, %c0_25, %c0_26] : memref<5x128x128xbf16, #tpu.memory_space<vmem>>, vector<1x128x128xbf16>
    %56 = vector.shape_cast %55 : vector<1x128x128xbf16> to vector<128x128xbf16>
    %cst_27 = arith.constant dense<0.000000e+00> : vector<128x128xf32>
    %57 = tpu.matmul %54, %56, %cst_27 {dimension_numbers = #tpu.dot_dimension_numbers<[1], [0], [0], [1], [0, 0, 1, 1], [], []>} : vector<128x128xbf16>, vector<128x128xbf16>, vector<128x128xf32> -> vector<128x128xf32>
    %58 = arith.addf %47, %57 : vector<128x128xf32>
    %c0_28 = arith.constant 0 : index
    %c0_29 = arith.constant 0 : index
    %59 = vector.load %arg3[%c0_28, %c0_29] : memref<1x128xf32, #tpu.memory_space<vmem>>, vector<1x128xf32>
    %60 = vector.broadcast %59 : vector<1x128xf32> to vector<128x128xf32>
    %61 = arith.addf %58, %60 : vector<128x128xf32>
    %cst_30 = arith.constant 5.000000e-01 : f32
    %62 = vector.broadcast %cst_30 : f32 to vector<128x128xf32>
    %63 = arith.mulf %62, %61 : vector<128x128xf32>
    %cst_31 = arith.constant 0.707106769 : f32
    %64 = vector.broadcast %cst_31 : f32 to vector<128x128xf32>
    %65 = arith.mulf %61, %64 : vector<128x128xf32>
    %cst_32 = arith.constant -3.8325069 : f32
    %cst_33 = arith.constant 3.8325069 : f32
    %66 = vector.broadcast %cst_32 : f32 to vector<128x128xf32>
    %67 = arith.maximumf %66, %65 : vector<128x128xf32>
    %68 = vector.broadcast %cst_33 : f32 to vector<128x128xf32>
    %69 = arith.minimumf %68, %67 : vector<128x128xf32>
    %70 = arith.mulf %69, %69 : vector<128x128xf32>
    %cst_34 = arith.constant 2.29050653E-4 : f32
    %71 = vector.broadcast %cst_34 : f32 to vector<128x128xf32>
    %72 = arith.mulf %71, %70 : vector<128x128xf32>
    %cst_35 = arith.constant 0.00340829091 : f32
    %73 = vector.broadcast %cst_35 : f32 to vector<128x128xf32>
    %74 = arith.addf %72, %73 : vector<128x128xf32>
    %75 = arith.mulf %74, %70 : vector<128x128xf32>
    %cst_36 = arith.constant 0.0509556942 : f32
    %76 = vector.broadcast %cst_36 : f32 to vector<128x128xf32>
    %77 = arith.addf %75, %76 : vector<128x128xf32>
    %78 = arith.mulf %77, %70 : vector<128x128xf32>
    %cst_37 = arith.constant 0.185208321 : f32
    %79 = vector.broadcast %cst_37 : f32 to vector<128x128xf32>
    %80 = arith.addf %78, %79 : vector<128x128xf32>
    %81 = arith.mulf %80, %70 : vector<128x128xf32>
    %cst_38 = arith.constant 1.12837911 : f32
    %82 = vector.broadcast %cst_38 : f32 to vector<128x128xf32>
    %83 = arith.addf %81, %82 : vector<128x128xf32>
    %cst_39 = arith.constant -1.17916031E-7 : f32
    %84 = vector.broadcast %cst_39 : f32 to vector<128x128xf32>
    %85 = arith.mulf %84, %70 : vector<128x128xf32>
    %cst_40 = arith.constant 2.35479656E-5 : f32
    %86 = vector.broadcast %cst_40 : f32 to vector<128x128xf32>
    %87 = arith.addf %85, %86 : vector<128x128xf32>
    %88 = arith.mulf %87, %70 : vector<128x128xf32>
    %cst_41 = arith.constant 0.00101796258 : f32
    %89 = vector.broadcast %cst_41 : f32 to vector<128x128xf32>
    %90 = arith.addf %88, %89 : vector<128x128xf32>
    %91 = arith.mulf %90, %70 : vector<128x128xf32>
    %cst_42 = arith.constant 0.0140704699 : f32
    %92 = vector.broadcast %cst_42 : f32 to vector<128x128xf32>
    %93 = arith.addf %91, %92 : vector<128x128xf32>
    %94 = arith.mulf %93, %70 : vector<128x128xf32>
    %cst_43 = arith.constant 0.110985048 : f32
    %95 = vector.broadcast %cst_43 : f32 to vector<128x128xf32>
    %96 = arith.addf %94, %95 : vector<128x128xf32>
    %97 = arith.mulf %96, %70 : vector<128x128xf32>
    %cst_44 = arith.constant 0.497469246 : f32
    %98 = vector.broadcast %cst_44 : f32 to vector<128x128xf32>
    %99 = arith.addf %97, %98 : vector<128x128xf32>
    %100 = arith.mulf %99, %70 : vector<128x128xf32>
    %cst_45 = arith.constant 1.000000e+00 : f32
    %101 = vector.broadcast %cst_45 : f32 to vector<128x128xf32>
    %102 = arith.addf %100, %101 : vector<128x128xf32>
    %103 = arith.mulf %69, %83 : vector<128x128xf32>
    %104 = tpu.reciprocal %102 {approx = true} : vector<128x128xf32> -> vector<128x128xf32>
    %105 = arith.mulf %103, %104 : vector<128x128xf32>
    %cst_46 = arith.constant 1.000000e+00 : f32
    %106 = vector.broadcast %cst_46 : f32 to vector<128x128xf32>
    %107 = arith.addf %106, %105 : vector<128x128xf32>
    %108 = arith.mulf %63, %107 : vector<128x128xf32>
    %109 = arith.truncf %108 : vector<128x128xf32> to vector<128x128xbf16>
    %c0_47 = arith.constant 0 : index
    %c0_48 = arith.constant 0 : index
    %110 = vector.load %arg4[%c0_47, %c0_48] : memref<128x128xbf16, #tpu.memory_space<vmem>>, vector<128x128xbf16>
    %cst_49 = arith.constant dense<0.000000e+00> : vector<128x128xf32>
    %111 = tpu.matmul %109, %110, %cst_49 {dimension_numbers = #tpu.dot_dimension_numbers<[1], [0], [0], [1], [0, 0, 1, 1], [], []>} : vector<128x128xbf16>, vector<128x128xbf16>, vector<128x128xf32> -> vector<128x128xf32>
    %c0_50 = arith.constant 0 : index
    %c0_51 = arith.constant 0 : index
    %112 = vector.load %arg5[%c0_50, %c0_51] : memref<1x128xf32, #tpu.memory_space<vmem>>, vector<1x128xf32>
    %113 = vector.broadcast %112 : vector<1x128xf32> to vector<128x128xf32>
    %114 = arith.addf %111, %113 : vector<128x128xf32>
    %115 = math.tanh %114 : vector<128x128xf32>
    %c0_52 = arith.constant 0 : index
    %c0_53 = arith.constant 0 : index
    %116 = vector.load %arg6[%c0_52, %c0_53] : memref<16x128xbf16, #tpu.memory_space<vmem>>, vector<16x128xbf16>
    %117 = arith.truncf %115 : vector<128x128xf32> to vector<128x128xbf16>
    %cst_54 = arith.constant dense<0.000000e+00> : vector<16x128xf32>
    %118 = tpu.matmul %116, %117, %cst_54 {dimension_numbers = #tpu.dot_dimension_numbers<[1], [1], [0], [0], [0, 0, 1, 0], [], []>} : vector<16x128xbf16>, vector<128x128xbf16>, vector<16x128xf32> -> vector<16x128xf32>
    %c0_55 = arith.constant 0 : index
    %c0_56 = arith.constant 0 : index
    %119 = vector.load %arg7[%c0_55, %c0_56] : memref<16x1xf32, #tpu.memory_space<vmem>>, vector<16x1xf32>
    %120 = vector.broadcast %119 : vector<16x1xf32> to vector<16x128xf32>
    %121 = arith.addf %118, %120 : vector<16x128xf32>
    %c0_57 = arith.constant 0 : index
    %c0_58 = arith.constant 0 : index
    %c0_59 = arith.constant 0 : index
    %122 = vector.load %arg8[%c0_57, %c0_58, %c0_59] : memref<1x16x128xf32, #tpu.memory_space<vmem>>, vector<1x16x128xf32>
    %123 = vector.shape_cast %122 : vector<1x16x128xf32> to vector<16x128xf32>
    %124 = vector.shape_cast %121 : vector<16x128xf32> to vector<1x16x128xf32>
    tpu.vector_store %arg8[%c0_57, %c0_58, %c0_59], %124 {strides = array<i32>} : memref<1x16x128xf32, #tpu.memory_space<vmem>>, vector<1x16x128xf32>,
    return
  }
  func.func @transform_0(%arg0: i32) -> (i32, i32, i32) {
    %c0_i32 = arith.constant 0 : i32
    %c0_i32_0 = arith.constant 0 : i32
    %c0_i32_1 = arith.constant 0 : i32
    return %arg0, %c0_i32, %c0_i32_0 : i32, i32, i32
  }
  func.func @transform_1(%arg0: i32) -> (i32, i32, i32) {
    %c0_i32 = arith.constant 0 : i32
    %c0_i32_0 = arith.constant 0 : i32
    %c0_i32_1 = arith.constant 0 : i32
    %c0_i32_2 = arith.constant 0 : i32
    return %c0_i32, %c0_i32_0, %c0_i32_1 : i32, i32, i32
  }
  func.func @transform_2(%arg0: i32) -> (i32, i32) {
    %c0_i32 = arith.constant 0 : i32
    %c0_i32_0 = arith.constant 0 : i32
    %c0_i32_1 = arith.constant 0 : i32
    return %c0_i32, %c0_i32_0 : i32, i32
  }
  func.func @transform_3(%arg0: i32) -> (i32, i32) {
    %c0_i32 = arith.constant 0 : i32
    %c0_i32_0 = arith.constant 0 : i32
    %c0_i32_1 = arith.constant 0 : i32
    return %c0_i32, %c0_i32_0 : i32, i32
  }
  func.func @transform_4(%arg0: i32) -> (i32, i32) {
    %c0_i32 = arith.constant 0 : i32
    %c0_i32_0 = arith.constant 0 : i32
    %c0_i32_1 = arith.constant 0 : i32
    return %c0_i32, %c0_i32_0 : i32, i32
  }
  func.func @transform_5(%arg0: i32) -> (i32, i32) {
    %c0_i32 = arith.constant 0 : i32
    %c0_i32_0 = arith.constant 0 : i32
    %c0_i32_1 = arith.constant 0 : i32
    return %c0_i32, %c0_i32_0 : i32, i32
  }
  func.func @transform_6(%arg0: i32) -> (i32, i32) {
    %c0_i32 = arith.constant 0 : i32
    %c0_i32_0 = arith.constant 0 : i32
    %c0_i32_1 = arith.constant 0 : i32
    return %c0_i32, %c0_i32_0 : i32, i32
  }
  func.func @transform_7(%arg0: i32) -> (i32, i32, i32) {
    %c0_i32 = arith.constant 0 : i32
    %c0_i32_0 = arith.constant 0 : i32
    %c0_i32_1 = arith.constant 0 : i32
    return %arg0, %c0_i32, %c0_i32_0 : i32, i32, i32
  }
}

</mosaic_0001>

<bundles_post_ra>
// kernel: pos_tagger_forward.1
= control target key start
LH: loop header
LB: loop body
LE: loop exit
PB: predicated region body
PF: predicated region fallthrough
CT: control target
= control target key end

     0   :  { %s2974_s24 = smov 0   ;;  %s3896_s0 = inlined_call_operand.vmem [shape: s32[2,136,1], index: 0, kind: input, shape index: {}]   ;;  %s3897_s1 = inlined_call_operand.vmem [shape: bf16[5,128,128], index: 1, kind: input, shape index: {}]   ;;  %s3898_s2 = inlined_call_operand.vmem [shape: f32[1,128], index: 2, kind: input, shape index: {}]   ;;  %s3899_s3 = inlined_call_operand.vmem [shape: bf16[128,128], index: 3, kind: input, shape index: {}]   ;;  %s3900_s4 = inlined_call_operand.vmem [shape: f32[1,128], index: 4, kind: input, shape index: {}]   ;;  %s3901_s5 = inlined_call_operand.vmem [shape: bf16[16,128], index: 5, kind: input, shape index: {}]   ;;  %s3902_s6 = inlined_call_operand.vmem [shape: f32[16,1], index: 6, kind: input, shape index: {}]   ;;  %s3903_s7 = inlined_call_operand.vmem [shape: f32[2,16,128], index: 7, kind: output, shape index: {}]  }
   0x1 LB: > { %s2255_s25 = sadd.s32 4294967295, %s2928_s24   ;;  %p2259_p0 = scmp.ge.s32.totalorder %s2928_s24, 1  ;;  %s2928_s24 = sphi %s2974_s24, %s17_s24  }
   0x2   : > { %p237_p1 = scmp.lt.s32.totalorder %s2928_s24, 3 }
   0x4   : > { %p238_p2 = pnand %p2259_p0, %p237_p1 }
   0x6   : > { %241 = sbr.rel (%p238_p2) target bundleno = 1079 (0x437), region = 48 }
   0xd   : > { %p269_p3 = scmp.lt.s32.totalorder %s2255_s25, 1  ;;  %v2930_v0 = vmov 0   ;;  %v2809_v1 = vld [vmem:[%s3897_s1] sm:$0xff]   ;;  %v2810_v2 = vld [vmem:[%s3897_s1 + $0x8] sm:$0xff]   ;;  %v2811_v4 = vld [vmem:[%s3897_s1 + $0x10] sm:$0xff]   ;;  %v297_v37 = vlaneseq  ;;  %v3904_v43 = vmov 0.0  }
   0xe   : > { %2808 = vset.pattern.permute.xlu1 %v2930_v0  ;;  %2807 = vset.pattern.permute.xlu0 %v2930_v0  ;;  %v2812_v3 = vld [vmem:[%s3897_s1 + $0x40] sm:$0xff]   ;;  %v2814_v5 = vld [vmem:[%s3897_s1 + $0x48] sm:$0xff]   ;;  %v2813_v10 = vld [vmem:[%s3897_s1 + $0x18] sm:$0xff]   ;;  %v2932_v51 = vmov 1.0|1.0  }
   0xf   : > { %s3927_s25 = smov (!%p269_p3, %s2255_s25), 1  ;;  %2550 = vmatprep.subr.bf16.mxu0 %v2809_v1  ;;  %2518 = vmatprep.subr.bf16.mxu1 %v2812_v3  ;;  %v2815_v13 = vld [vmem:[%s3897_s1 + $0x20] sm:$0xff]   ;;  %v2816_v14 = vld [vmem:[%s3897_s1 + $0x50] sm:$0xff]   ;;  %v2818_v16 = vld [vmem:[%s3897_s1 + $0x58] sm:$0xff]   ;;  %v3064_v38 = vand.u32 127, %v297_v37 }
  0x10   : > { %s2794_s30 = smul.u32 136, %s3927_s25  ;;  %2551 = vmatpush3.bf16.msra.mxu0 %v2809_v1  ;;  %2519 = vmatpush3.bf16.msra.mxu1 %v2812_v3  ;;  %v2817_v18 = vld [vmem:[%s3897_s1 + $0x28] sm:$0xff]   ;;  %v2820_v19 = vld [vmem:[%s3897_s1 + $0x60] sm:$0xff]   ;;  %v2819_v22 = vld [vmem:[%s3897_s1 + $0x30] sm:$0xff]   ;;  %vm426_vm9 = vsmask.f32 7424 }
  0x11   : > { %2552 = vmatprep.subr.bf16.mxu0 %v2810_v2  ;;  %2520 = vmatprep.subr.bf16.mxu1 %v2814_v5  ;;  %v2822_v23 = vld [vmem:[%s3897_s1 + $0x68] sm:$0xff]   ;;  %v2821_v26 = vld [vmem:[%s3897_s1 + $0x38] sm:$0xff]   ;;  %v2824_v27 = vld [vmem:[%s3897_s1 + $0x70] sm:$0xff]   ;;  %s2412_s8 = sshll.u32 %s3927_s25, 4 }
  0x12   : > { %s3000_s14 = scalar_lea.vmem %s3896_s0, %s2794_s30  ;;  %v2823_v30 = vld [vmem:[%s3897_s1 + $0x80] sm:$0xff]   ;;  %v2826_v31 = vld [vmem:[%s3897_s1 + $0x78] sm:$0xff]   ;;  %v2140_v36 = vld [vmem:[%s3902_s6 + $0x8] sm:$0xff]  ;;  %s278_s11 = scalar_lea.vmem %s3903_s7, %s2412_s8 }
  0x13   : > { %v282_v6 = vld [vmem:[%s3000_s14 + $0x10] sm:$0xff]  ;;  %v280_v7 = vld [vmem:[%s3000_s14] sm:$0xff]  ;;  %v283_v8 = vld [vmem:[%s3000_s14 + $0x18] sm:$0xff] }
  0x14   : > { %306 = vperm.xlu1 %2808, %v282_v6   ;;  %300 = vperm.xlu0 %2807, %v280_v7   ;;  %v281_v9 = vld [vmem:[%s3000_s14 + $0x8] sm:$0xff]  ;;  %v284_v12 = vld [vmem:[%s3000_s14 + $0x20] sm:$0xff]  ;;  %v287_v15 = vld [vmem:[%s3000_s14 + $0x38] sm:$0xff] }
  0x15   : > { %2553 = vmatpush3.bf16.msra.mxu0 %v2810_v2  ;;  %2521 = vmatpush3.bf16.msra.mxu1 %v2814_v5  ;;  %v285_v11 = vld [vmem:[%s3000_s14 + $0x28] sm:$0xff]  ;;  %v286_v17 = vld [vmem:[%s3000_s14 + $0x30] sm:$0xff]  ;;  %v288_v21 = vld [vmem:[%s3000_s14 + $0x40] sm:$0xff] }
  0x16   : > { %2554 = vmatprep.subr.bf16.mxu0 %v2811_v4  ;;  %2522 = vmatprep.subr.bf16.mxu1 %v2816_v14  ;;  %v289_v20 = vld [vmem:[%s3000_s14 + $0x48] sm:$0xff]  ;;  %v291_v24 = vld [vmem:[%s3000_s14 + $0x58] sm:$0xff]  ;;  %v290_v25 = vld [vmem:[%s3000_s14 + $0x50] sm:$0xff] }
  0x17   : > { %v293_v28 = vld [vmem:[%s3000_s14 + $0x68] sm:$0xff]  ;;  %v292_v29 = vld [vmem:[%s3000_s14 + $0x60] sm:$0xff]  ;;  %v295_v32 = vld [vmem:[%s3000_s14 + $0x78] sm:$0xff] }
  0x18   : > { %309 = vperm.xlu1 %2808, %v283_v8   ;;  %303 = vperm.xlu0 %2807, %v281_v9   ;;  %v294_v33 = vld [vmem:[%s3000_s14 + $0x70] sm:$0xff]  ;;  %v2139_v34 = vld [vmem:[%s3902_s6] sm:$0xff]  ;;  %v2825_v50 = vld [vmem:[%s3897_s1 + $0x88] sm:$0xff]  }
  0x19   : > { %2555 = vmatpush3.bf16.msra.mxu0 %v2811_v4  ;;  %2523 = vmatpush3.bf16.msra.mxu1 %v2816_v14  ;;  %v296_v35 = vld [vmem:[%s3000_s14 + $0x80] sm:$0xff]  ;;  %v2827_v59 = vld [vmem:[%s3897_s1 + $0x90] sm:$0xff]  }
  0x1a   : > { %2556 = vmatprep.subr.bf16.mxu0 %v2813_v10  ;;  %2524 = vmatprep.subr.bf16.mxu1 %v2818_v16 }
  0x1c   : > { %315 = vperm.xlu1 %2808, %v285_v11   ;;  %312 = vperm.xlu0 %2807, %v284_v12  }
  0x1d   : > { %2557 = vmatpush3.bf16.msra.mxu0 %v2813_v10  ;;  %2525 = vmatpush3.bf16.msra.mxu1 %v2818_v16  ;;  %v2828_v10 = vld [vmem:[%s3897_s1 + $0x98] sm:$0xff]  }
  0x1e   : > { %2558 = vmatprep.subr.bf16.mxu0 %v2815_v13  ;;  %2526 = vmatprep.subr.bf16.mxu1 %v2820_v19 }
  0x20   : > { %321 = vperm.xlu1 %2808, %v287_v15   ;;  %318 = vperm.xlu0 %2807, %v286_v17  }
  0x21   : > { %2559 = vmatpush3.bf16.msra.mxu0 %v2815_v13  ;;  %2527 = vmatpush3.bf16.msra.mxu1 %v2820_v19  ;;  %v2829_v19 = vld [vmem:[%s3897_s1 + $0xa0] sm:$0xff]  }
  0x22   : > { %2560 = vmatprep.subr.bf16.mxu0 %v2817_v18  ;;  %2528 = vmatprep.subr.bf16.mxu1 %v2822_v23 }
  0x24   : > { %327 = vperm.xlu1 %2808, %v289_v20   ;;  %324 = vperm.xlu0 %2807, %v288_v21  }
  0x25   : > { %2561 = vmatpush3.bf16.msra.mxu0 %v2817_v18  ;;  %2529 = vmatpush3.bf16.msra.mxu1 %v2822_v23 }
  0x26   : > { %2562 = vmatprep.subr.bf16.mxu0 %v2819_v22  ;;  %2530 = vmatprep.subr.bf16.mxu1 %v2824_v27 }
  0x28   : > { %333 = vperm.xlu1 %2808, %v291_v24   ;;  %330 = vperm.xlu0 %2807, %v290_v25  }
  0x29   : > { %2563 = vmatpush3.bf16.msra.mxu0 %v2819_v22  ;;  %2531 = vmatpush3.bf16.msra.mxu1 %v2824_v27 }
  0x2a   : > { %2564 = vmatprep.subr.bf16.mxu0 %v2821_v26  ;;  %2532 = vmatprep.subr.bf16.mxu1 %v2826_v31 }
  0x2c   : > { %339 = vperm.xlu1 %2808, %v293_v28   ;;  %336 = vperm.xlu0 %2807, %v292_v29  }
  0x2d   : > { %2565 = vmatpush3.bf16.msra.mxu0 %v2821_v26  ;;  %2533 = vmatpush3.bf16.msra.mxu1 %v2826_v31 }
  0x2e   : > { %2582 = vmatprep.subr.bf16.mxu0 %v2823_v30 }
  0x30   : > { %345 = vperm.xlu1 %2808, %v295_v32   ;;  %342 = vperm.xlu0 %2807, %v294_v33   ;;  %v2830_v32 = vld [vmem:[%s3897_s1 + $0xa8] sm:$0xff]  }
  0x34   : > { %2143 = vperm.xlu1 %2808, %v2139_v34   ;;  %404 = vperm.xlu0 %2807, %v296_v35  }
  0x38   : > { %2148 = vperm.xlu0 %2807, %v2140_v36  }
  0x93   : > { %v307_v39 = vpop.permute.xlu1 %306  ;;  %v301_v40 = vpop.permute.xlu0 %300 }
  0x94   : > { %vm349_vm0 = vcmp.eq.s32.totalorder %v307_v39, %v3064_v38  ;;  %vm347_vm1 = vcmp.eq.s32.totalorder %v301_v40, %v3064_v38 }
  0x95   : > { %v365_v44 = vsel %vm349_vm0, 1.0, %v3904_v43  ;;  %v363_v45 = vsel %vm347_vm1, 1.0, %v3904_v43 }
  0x97   : > { %v310_v41 = vpop.permute.xlu1 %309  ;;  %v304_v42 = vpop.permute.xlu0 %303 }
  0x98   : > { %vm350_vm2 = vcmp.eq.s32.totalorder %v310_v41, %v3064_v38  ;;  %vm348_vm3 = vcmp.eq.s32.totalorder %v304_v42, %v3064_v38  ;;  %v2831_v42 = vld [vmem:[%s3897_s1 + $0xb0] sm:$0xff]  }
  0x99   : > { %v366_v46 = vsel %vm350_vm2, 1.0, %v3904_v43  ;;  %vm2297_vm4 = vmpackc.low %vm350_vm2, %vm349_vm0  ;;  %v364_v47 = vsel %vm348_vm3, 1.0, %v3904_v43 }
  0x9a   : > { %v3074_v48 = vpack.c.bf16 %v366_v46, %v365_v44  ;;  %v3076_v49 = vpack.c.bf16 %v364_v47, %v363_v45  ;;  %vm2295_vm5 = vmpackc.low %vm348_vm3, %vm347_vm1 }
  0x9b   : > { %2566 = vmatprep.mubr.msk.bf16.mxu0 %vm2295_vm5, %v2932_v51  ;;  %v316_v52 = vpop.permute.xlu1 %315  ;;  %v313_v53 = vpop.permute.xlu0 %312 }
  0x9c   : > { %vm352_vm6 = vcmp.eq.s32.totalorder %v316_v52, %v3064_v38  ;;  %2567 = vmatmul.mubr.msk.bf16.vlgmr.msra.gmra.mrb[0].mxu0 %vm2297_vm4, %v2932_v51  ;;  %vm351_vm7 = vcmp.eq.s32.totalorder %v313_v53, %v3064_v38  ;;  %v430_v54 = vshll.u32 %v3076_v49, 16  ;;  %v435_v57 = vshll.u32 %v3074_v48, 16 }
  0x9d   : > { %v368_v55 = vsel %vm352_vm6, 1.0, %v3904_v43  ;;  %2583 = vmatpush3.bf16.msra.mxu0 %v2823_v30  ;;  %v367_v56 = vsel %vm351_vm7, 1.0, %v3904_v43  ;;  %vm2299_vm8 = vmpackc.low %vm352_vm6, %vm351_vm7  ;;  %v428_v60 = vshrl.u32 %v3076_v49, 16  ;;  %v439_v1 = vshrl.u32 %v3074_v48, 16 }
  0x9e   : > { %v3089_v58 = vpack.c.bf16 %v368_v55, %v367_v56  ;;  %2570 = vmatprep.mubr.msk.bf16.mxu0 %vm2299_vm8, %v2932_v51  ;;  %2584 = vmatprep.subr.bf16.mxu0 %v2825_v50  ;;  %v432_v61 = vrot.slane %v430_v54, 1  ;;  %v437_v0 = vrot.slane %v435_v57, 1  ;;  %vm819_vm6 = vcmask 1046528  }
  0x9f   : > { %v322_v62 = vpop.permute.xlu1 %321  ;;  %v319_v63 = vpop.permute.xlu0 %318  ;;  %v821_v52 = vrot.slane %v3074_v48, 1 }
  0xa0   : > { %vm354_vm10 = vcmp.eq.s32.totalorder %v322_v62, %v3064_v38  ;;  %vm353_vm11 = vcmp.eq.s32.totalorder %v319_v63, %v3064_v38  ;;  %v433_v2 = vor.u32 %v432_v61, %v428_v60  ;;  %v443_v3 = vshll.u32 %v3089_v58, 16 }
  0xa1   : > { %v370_v4 = vsel %vm354_vm10, 1.0, %v3904_v43  ;;  %2585 = vmatpush3.bf16.msra.mxu0 %v2825_v50  ;;  %v369_v5 = vsel %vm353_vm11, 1.0, %v3904_v43  ;;  %vm2301_vm12 = vmpackc.low %vm354_vm10, %vm353_vm11  ;;  %v441_v8 = vor.u32 %v439_v1, %v437_v0  ;;  %v447_v16 = vshrl.u32 %v3089_v58, 16 }
  0xa2   : > { %v3108_v6 = vpack.c.bf16 %v370_v4, %v369_v5  ;;  %2586 = vmatprep.subr.bf16.mxu0 %v2827_v59  ;;  %v438_v7 = vsel %vm426_vm9, %v433_v2, %v437_v0  ;;  %v445_v9 = vrot.slane %v443_v3, 1  ;;  %v820_v50 = vrot.slane %v3076_v49, 1  ;;  %v2832_v2 = vld [vmem:[%s3897_s1 + $0xb8] sm:$0xff]  }
  0xa3   : > { %v328_v11 = vpop.permute.xlu1 %327  ;;  %2534 = vmatprep.mubr.bf16.mxu1 %v438_v7  ;;  %v325_v12 = vpop.permute.xlu0 %324 }
  0xa4   : > { %vm356_vm13 = vcmp.eq.s32.totalorder %v328_v11, %v3064_v38  ;;  %2571 = vmatmul.mubr.msk.bf16.gmra.mrb[4].mxu0 %vm2301_vm12, %v2932_v51  ;;  %vm355_vm14 = vcmp.eq.s32.totalorder %v325_v12, %v3064_v38  ;;  %v446_v13 = vsel %vm426_vm9, %v441_v8, %v445_v9  ;;  %v451_v17 = vshll.u32 %v3108_v6, 16 }
  0xa5   : > { %v372_v14 = vsel %vm356_vm13, 1.0, %v3904_v43  ;;  %2587 = vmatpush3.bf16.msra.mxu0 %v2827_v59  ;;  %v371_v15 = vsel %vm355_vm14, 1.0, %v3904_v43  ;;  %vm2303_vm15 = vmpackc.low %vm356_vm13, %vm355_vm14  ;;  %2535 = vmatmul.mubr.bf16.vlgmr.msra.gmra.mrb[0].mxu1 %v446_v13  ;;  %v449_v22 = vor.u32 %v447_v16, %v445_v9  ;;  %v455_v24 = vshrl.u32 %v3108_v6, 16 }
  0xa6   : > { %v3126_v18 = vpack.c.bf16 %v372_v14, %v371_v15  ;;  %2574 = vmatprep.mubr.msk.bf16.mxu0 %vm2303_vm15, %v2932_v51  ;;  %2588 = vmatprep.subr.bf16.mxu0 %v2828_v10  ;;  %v453_v23 = vrot.slane %v451_v17, 1  ;;  %v822_v5 = vsel %vm819_vm6, %v820_v50, %v821_v52  ;;  %v823_v13 = vrot.slane %v3089_v58, 1 }
  0xa7   : > { %v334_v20 = vpop.permute.xlu1 %333  ;;  %v331_v21 = vpop.permute.xlu0 %330  ;;  %v825_v14 = vrot.slane %v3108_v6, 1  ;;  %vm1247_vm12 = vcmask 1045504   ;;  %vm2933_vm13 = vmmov 0  }
  0xa8   : > { %vm358_vm0 = vcmp.eq.s32.totalorder %v334_v20, %v3064_v38  ;;  %vm357_vm1 = vcmp.eq.s32.totalorder %v331_v21, %v3064_v38  ;;  %v459_v25 = vshll.u32 %v3126_v18, 16  ;;  %v454_v28 = vsel %vm426_vm9, %v449_v22, %v453_v23 }
  0xa9   : > { %v374_v26 = vsel %vm358_vm0, 1.0, %v3904_v43  ;;  %2589 = vmatpush3.bf16.msra.mxu0 %v2828_v10  ;;  %v373_v27 = vsel %vm357_vm1, 1.0, %v3904_v43  ;;  %vm2305_vm2 = vmpackc.low %vm358_vm0, %vm357_vm1  ;;  %2538 = vmatprep.mubr.bf16.mxu1 %v454_v28  ;;  %v457_v30 = vor.u32 %v455_v24, %v453_v23  ;;  %v463_v39 = vshrl.u32 %v3126_v18, 16 }
  0xaa   : > { %v3143_v29 = vpack.c.bf16 %v374_v26, %v373_v27  ;;  %2590 = vmatprep.subr.bf16.mxu0 %v2829_v19  ;;  %v461_v31 = vrot.slane %v459_v25, 1  ;;  %v1248_v21 = vrot.slane %v3076_v49, 2  ;;  %v2834_v26 = vld [vmem:[%s3897_s1 + $0xc8] sm:$0xff]   ;;  %v1249_v27 = vrot.slane %v3074_v48, 2  ;;  %v2840_v49 = vld [vmem:[%s3897_s1 + $0xf8] sm:$0xff]  }
  0xab   : > { %v340_v33 = vpop.permute.xlu1 %339  ;;  %v337_v34 = vpop.permute.xlu0 %336  ;;  %v824_v28 = vsel %vm819_vm6, %v821_v52, %v823_v13  ;;  %v827_v52 = vrot.slane %v3126_v18, 1  ;;  %v1032_v48 = vrot.slane %v443_v3, 2  ;;  %v2841_v3 = vld [vmem:[%s3897_s1 + $0x100] sm:$0xff]  }
  0xac   : > { %vm360_vm3 = vcmp.eq.s32.totalorder %v340_v33, %v3064_v38  ;;  %2575 = vmatmul.mubr.msk.bf16.gmra.mrb[8].mxu0 %vm2305_vm2, %v2932_v51  ;;  %vm359_vm4 = vcmp.eq.s32.totalorder %v337_v34, %v3064_v38  ;;  %v462_v35 = vsel %vm426_vm9, %v457_v30, %v461_v31  ;;  %v467_v40 = vshll.u32 %v3143_v29, 16 }
  0xad   : > { %v376_v36 = vsel %vm360_vm3, 1.0, %v3904_v43  ;;  %2591 = vmatpush3.bf16.msra.mxu0 %v2829_v19  ;;  %v375_v37 = vsel %vm359_vm4, 1.0, %v3904_v43  ;;  %vm2307_vm5 = vmpackc.low %vm360_vm3, %vm359_vm4  ;;  %2539 = vmatmul.mubr.bf16.gmra.mrb[4].mxu1 %v462_v35  ;;  %v465_v46 = vor.u32 %v463_v39, %v461_v31  ;;  %v471_v53 = vshrl.u32 %v3143_v29, 16 }
  0xae   : > { %v3160_v41 = vpack.c.bf16 %v376_v36, %v375_v37  ;;  %2578 = vmatprep.mubr.msk.bf16.mxu0 %vm2307_vm5, %v2932_v51  ;;  %2592 = vmatprep.subr.bf16.mxu0 %v2830_v32  ;;  %v469_v47 = vrot.slane %v467_v40, 1  ;;  %v826_v30 = vsel %vm819_vm6, %v823_v13, %v825_v14  ;;  %v1251_v31 = vrot.slane %v3089_v58, 2 }
  0xaf   : > { %v346_v44 = vpop.permute.xlu1 %345  ;;  %v343_v45 = vpop.permute.xlu0 %342  ;;  %v3223_v33 = vsel %vm1247_vm12, %v1248_v21, %v1249_v27  ;;  %v1253_v34 = vrot.slane %v3108_v6, 2  ;;  %v1255_v35 = vrot.slane %v3126_v18, 2  ;;  %v1257_v37 = vrot.slane %v3143_v29, 2  ;;  %v2844_v18 = vld [vmem:[%s3897_s1 + $0x118] sm:$0xff]  }
  0xb0   : > { %vm362_vm7 = vcmp.eq.s32.totalorder %v346_v44, %v3064_v38  ;;  %vm361_vm8 = vcmp.eq.s32.totalorder %v343_v45, %v3064_v38  ;;  %v475_v55 = vshll.u32 %v3160_v41, 16  ;;  %v470_v61 = vsel %vm426_vm9, %v465_v46, %v469_v47  ;;  %v2835_v44 = vld [vmem:[%s3897_s1 + $0xd0] sm:$0xff]  }
  0xb1   : > { %v378_v56 = vsel %vm362_vm7, 1.0, %v3904_v43  ;;  %2593 = vmatpush3.bf16.msra.mxu0 %v2830_v32  ;;  %v377_v59 = vsel %vm361_vm8, 1.0, %v3904_v43  ;;  %vm2309_vm10 = vmpackc.low %vm362_vm7, %vm361_vm8  ;;  %2542 = vmatprep.mubr.bf16.mxu1 %v470_v61  ;;  %v473_v63 = vor.u32 %v471_v53, %v469_v47  ;;  %v479_v8 = vshrl.u32 %v3160_v41, 16 }
  0xb2   : > { %v3179_v62 = vpack.c.bf16 %v378_v56, %v377_v59  ;;  %2594 = vmatprep.subr.bf16.mxu0 %v2831_v42  ;;  %v477_v0 = vrot.slane %v475_v55, 1  ;;  %v3228_v36 = vsel %vm1247_vm12, %v1249_v27, %v1251_v31  ;;  %v3236_v45 = vsel %vm1247_vm12, %v1251_v31, %v1253_v34  ;;  %v2842_v31 = vld [vmem:[%s3897_s1 + $0x108] sm:$0xff]  }
  0xb3   : > { %v405_v4 = vpop.permute.xlu0 %404  ;;  %v3239_v46 = vsel %vm1247_vm12, %v1253_v34, %v1255_v35  ;;  %v3245_v56 = vsel %vm1247_vm12, %v1255_v35, %v1257_v37  ;;  %v829_v61 = vrot.slane %v3143_v29, 1  ;;  %v1024_v13 = vrot.slane %v428_v60, 1 }
  0xb4   : > { %2579 = vmatmul.mubr.msk.bf16.gmra.mrb[12].mxu0 %vm2309_vm10, %v2932_v51  ;;  %vm406_vm11 = vcmp.eq.s32.totalorder %v405_v4, %v3064_v38  ;;  %v478_v7 = vsel %vm426_vm9, %v473_v63, %v477_v0  ;;  %v483_v9 = vshll.u32 %v3179_v62, 16  ;;  %v481_v12 = vor.u32 %v479_v8, %v477_v0  ;;  %v2833_v51 = vld [vmem:[%s3897_s1 + $0xc0] sm:$0xff]  }
  0xb5   : > { %2595 = vmatpush3.bf16.msra.mxu0 %v2831_v42  ;;  %v407_v10 = vsel %vm406_vm11, 1.0, %v3904_v43  ;;  %2598 = vmatprep.mubr.bf16.mxu0 %v822_v5  ;;  %v487_v19 = vshrl.u32 %v3179_v62, 16  ;;  %v1259_v42 = vrot.slane %v3160_v41, 2  ;;  %v1261_v47 = vrot.slane %v3179_v62, 2 }
  0xb6   : > { %v3195_v11 = vpack.c.bf16 %v407_v10, %v407_v10  ;;  %2543 = vmatmul.mubr.bf16.gmra.mrb[8].mxu1 %v478_v7  ;;  %2596 = vmatprep.subr.bf16.mxu0 %v2832_v2  ;;  %v485_v38 = vrot.slane %v483_v9, 1  ;;  %v828_v4 = vsel %vm819_vm6, %v825_v14, %v827_v52  ;;  %v830_v5 = vsel %vm819_vm6, %v827_v52, %v829_v61  ;;  %v2837_v7 = vld [vmem:[%s3897_s1 + $0xe0] sm:$0xff]  }
  0xb7   : > { %v3248_v59 = vsel %vm1247_vm12, %v1257_v37, %v1259_v42  ;;  %v3252_v63 = vsel %vm1247_vm12, %v1259_v42, %v1261_v47  ;;  %v831_v10 = vrot.slane %v3160_v41, 1  ;;  %v1027_v21 = vrot.slane %v439_v1, 1  ;;  %v2843_v37 = vld [vmem:[%s3897_s1 + $0x110] sm:$0xff]  }
  0xb8   : > { %v486_v15 = vsel %vm426_vm9, %v481_v12, %v485_v38  ;;  %v491_v20 = vshll.u32 %v3195_v11, 16  ;;  %v489_v22 = vor.u32 %v487_v19, %v485_v38  ;;  %v1263_v50 = vrot.slane %v3195_v11, 2  ;;  %v2838_v38 = vld [vmem:[%s3897_s1 + $0xe8] sm:$0xff]  }
  0xb9   : > { %2597 = vmatpush3.bf16.msra.mxu0 %v2832_v2  ;;  %2546 = vmatprep.mubr.bf16.mxu1 %v486_v15  ;;  %v2836_v2 = vld [vmem:[%s3897_s1 + $0xd8] sm:$0xff]   ;;  %v833_v12 = vrot.slane %v3179_v62, 1  ;;  %v1025_v15 = vrot.slane %v430_v54, 2  ;;  %v835_v60 = vrot.slane %v3195_v11, 1  ;;  %v1031_v54 = vrot.slane %v447_v16, 1 }
  0xba   : > { %2614 = vmatprep.subr.bf16.mxu0 %v2833_v51  ;;  %v493_v23 = vrot.slane %v491_v20, 1  ;;  %v3255_v0 = vsel %vm1247_vm12, %v1261_v47, %v1263_v50  ;;  %v1039_v6 = vrot.slane %v463_v39, 1  ;;  %v1043_v34 = vrot.slane %v471_v53, 1  ;;  %v2845_v50 = vld [vmem:[%s3897_s1 + $0x120] sm:$0xff]  }
  0xbb   : > { %v834_v14 = vsel %vm819_vm6, %v831_v10, %v833_v12  ;;  %v1033_v58 = vor.u32 %v1032_v48, %v1031_v54  ;;  %v1044_v35 = vrot.slane %v467_v40, 2  ;;  %v1047_v29 = vrot.slane %v479_v8, 1  ;;  %v3403_v54 = vld [vmem:[%s3898_s2] ss:$0 sm:$0xff] }
  0xbc   : > { %2599 = vmatmul.mubr.bf16.vlgmr.msra.gmra.mrb[0].mxu0 %v824_v28  ;;  %v494_v32 = vsel %vm426_vm9, %v489_v22, %v493_v23  ;;  %v1028_v22 = vrot.slane %v435_v57, 2  ;;  %v2839_v23 = vld [vmem:[%s3897_s1 + $0xf0] sm:$0xff]   ;;  %vm1023_vm9 = vsmask.f32 6400  ;;  %v836_v57 = vsel %vm819_vm6, %v833_v12, %v835_v60  ;;  %v2853_v60 = vld [vmem:[%s3899_s3 + $0x20] sm:$0xff]  }
  0xbd   : > { %2615 = vmatpush3.bf16.msra.mxu0 %v2833_v51  ;;  %2602 = vmatprep.mubr.bf16.mxu0 %v826_v30  ;;  %v832_v51 = vsel %vm819_vm6, %v829_v61, %v831_v10  ;;  %v1035_v28 = vrot.slane %v455_v24, 1  ;;  %v1036_v30 = vrot.slane %v451_v17, 2  ;;  %v1040_v17 = vrot.slane %v459_v25, 2 }
  0xbe   : > { %2547 = vmatmul.mubr.bf16.gmra.mrb[12].mxu1 %v494_v32  ;;  %2616 = vmatprep.subr.bf16.mxu0 %v2834_v26  ;;  %v1029_v27 = vor.u32 %v1028_v22, %v1027_v21  ;;  %v1045_v42 = vor.u32 %v1044_v35, %v1043_v34  ;;  %v1048_v40 = vrot.slane %v475_v55, 2  ;;  %v1052_v47 = vrot.slane %v483_v9, 2 }
  0xbf   : > { %v1037_v16 = vor.u32 %v1036_v30, %v1035_v28  ;;  %v1041_v39 = vor.u32 %v1040_v17, %v1039_v6  ;;  %v1055_v41 = vshrl.u32 %v3195_v11, 16  ;;  %v1058_v52 = vrot.slane %v491_v20, 2 }
  0xc0   : > { %v1034_v24 = vsel %vm1023_vm9, %v1029_v27, %v1033_v58  ;;  %v1049_v8 = vor.u32 %v1048_v40, %v1047_v29 }
  0xc1   : > { %2617 = vmatpush3.bf16.msra.mxu0 %v2834_v26  ;;  %v1026_v26 = vor.u32 %v1025_v15, %v1024_v13  ;;  %v1038_v32 = vsel %vm1023_vm9, %v1033_v58, %v1037_v16  ;;  %v1042_v25 = vsel %vm1023_vm9, %v1037_v16, %v1041_v39  ;;  %v1046_v53 = vsel %vm1023_vm9, %v1041_v39, %v1045_v42  ;;  %v2851_v13 = vld [vmem:[%s3899_s3 + $0x10] sm:$0xff]   ;;  %v2852_v15 = vld [vmem:[%s3899_s3 + $0x18] sm:$0xff]  }
  0xc2   : > { %2618 = vmatprep.subr.bf16.mxu0 %v2835_v44  ;;  %v1050_v62 = vsel %vm1023_vm9, %v1045_v42, %v1049_v8  ;;  %v1057_v9 = vrot.slane %v1055_v41, 1 }
  0xc3   : > { %v1030_v1 = vsel %vm1023_vm9, %v1026_v26, %v1029_v27  ;;  %v2854_v26 = vld [vmem:[%s3899_s3 + $0x28] sm:$0xff]   ;;  %v2855_v27 = vld [vmem:[%s3899_s3 + $0x30] sm:$0xff]  }
  0xc4   : > { %2603 = vmatmul.mubr.bf16.gmra.mrb[4].mxu0 %v828_v4  ;;  %v1059_v4 = vor.u32 %v1058_v52, %v1057_v9 }
  0xc5   : > { %2619 = vmatpush3.bf16.msra.mxu0 %v2835_v44  ;;  %2606 = vmatprep.mubr.bf16.mxu0 %v830_v5  ;;  %v1051_v44 = vrot.slane %v487_v19, 1  ;;  %v2846_v19 = vld [vmem:[%s3897_s1 + $0x128] sm:$0xff]   ;;  %v2848_v5 = vld [vmem:[%s3897_s1 + $0x138] sm:$0xff]  }
  0xc6   : > { %2620 = vmatprep.subr.bf16.mxu0 %v2836_v2 }
  0xc7   : > { %v1053_v55 = vor.u32 %v1052_v47, %v1051_v44 }
  0xc9   : > { %2621 = vmatpush3.bf16.msra.mxu0 %v2836_v2  ;;  %v1054_v61 = vsel %vm1023_vm9, %v1049_v8, %v1053_v55  ;;  %v2847_v2 = vld [vmem:[%s3897_s1 + $0x130] sm:$0xff]   ;;  %v1060_v11 = vsel %vm1023_vm9, %v1053_v55, %v1059_v4 }
  0xca   : > { %2622 = vmatprep.subr.bf16.mxu0 %v2837_v7 }
  0xcc   : > { %2607 = vmatmul.mubr.bf16.gmra.mrb[8].mxu0 %v832_v51 }
  0xcd   : > { %2623 = vmatpush3.bf16.msra.mxu0 %v2837_v7  ;;  %2610 = vmatprep.mubr.bf16.mxu0 %v834_v14 }
  0xce   : > { %2624 = vmatprep.subr.bf16.mxu0 %v2838_v38 }
  0xd1   : > { %2625 = vmatpush3.bf16.msra.mxu0 %v2838_v38 }
  0xd2   : > { %2626 = vmatprep.subr.bf16.mxu0 %v2839_v23 }
  0xd4   : > { %2611 = vmatmul.mubr.bf16.gmra.mrb[12].mxu0 %v836_v57 }
  0xd5   : > { %2627 = vmatpush3.bf16.msra.mxu0 %v2839_v23  ;;  %2630 = vmatprep.mubr.bf16.mxu0 %v1030_v1 }
  0xd6   : > { %2628 = vmatprep.subr.bf16.mxu0 %v2840_v49 }
  0xd9   : > { %2629 = vmatpush3.bf16.msra.mxu0 %v2840_v49  ;;  %v2856_v49 = vld [vmem:[%s3899_s3 + $0x38] sm:$0xff]  }
  0xda   : > { %2646 = vmatprep.subr.bf16.mxu0 %v2841_v3 }
  0xdc   : > { %2631 = vmatmul.mubr.bf16.vlgmr.msra.gmra.mrb[0].mxu0 %v1034_v24 }
  0xdd   : > { %2647 = vmatpush3.bf16.msra.mxu0 %v2841_v3  ;;  %2634 = vmatprep.mubr.bf16.mxu0 %v1038_v32 }
  0xde   : > { %2648 = vmatprep.subr.bf16.mxu0 %v2842_v31 }
  0xe1   : > { %2649 = vmatpush3.bf16.msra.mxu0 %v2842_v31 }
  0xe2   : > { %2650 = vmatprep.subr.bf16.mxu0 %v2843_v37 }
  0xe4   : > { %2635 = vmatmul.mubr.bf16.gmra.mrb[4].mxu0 %v1042_v25 }
  0xe5   : > { %2651 = vmatpush3.bf16.msra.mxu0 %v2843_v37  ;;  %2638 = vmatprep.mubr.bf16.mxu0 %v1046_v53 }
  0xe6   : > { %2652 = vmatprep.subr.bf16.mxu0 %v2844_v18 }
  0xe9   : > { %2653 = vmatpush3.bf16.msra.mxu0 %v2844_v18 }
  0xea   : > { %2654 = vmatprep.subr.bf16.mxu0 %v2845_v50 }
  0xec   : > { %2639 = vmatmul.mubr.bf16.gmra.mrb[8].mxu0 %v1050_v62 }
  0xed   : > { %2655 = vmatpush3.bf16.msra.mxu0 %v2845_v50  ;;  %2642 = vmatprep.mubr.bf16.mxu0 %v1054_v61 }
  0xee   : > { %2656 = vmatprep.subr.bf16.mxu0 %v2846_v19 }
  0xf1   : > { %2657 = vmatpush3.bf16.msra.mxu0 %v2846_v19 }
  0xf2   : > { %2658 = vmatprep.subr.bf16.mxu0 %v2847_v2 }
  0xf4   : > { %2643 = vmatmul.mubr.bf16.gmra.mrb[12].mxu0 %v1060_v11 }
  0xf5   : > { %2659 = vmatpush3.bf16.msra.mxu0 %v2847_v2  ;;  %2662 = vmatprep.mubr.bf16.mxu0 %v3223_v33 }
  0xf6   : > { %2660 = vmatprep.subr.bf16.mxu0 %v2848_v5 }
  0xf9   : > { %2661 = vmatpush3.bf16.msra.mxu0 %v2848_v5 }
  0xfc   : > { %2663 = vmatmul.mubr.bf16.vlgmr.msra.gmra.mrb[0].mxu0 %v3228_v36 }
  0xfd   : > { %2666 = vmatprep.mubr.bf16.mxu0 %v3236_v45  ;;  %v2849_v45 = vld [vmem:[%s3899_s3] sm:$0xff]  }
  0xfe   : > { %2678 = vmatprep.subr.bf16.mxu1 %v2849_v45 }
  0xff   : > { %2679 = vmatpush3.bf16.msra.mxu1 %v2849_v45 }
 0x104   : > { %2667 = vmatmul.mubr.bf16.gmra.mrb[4].mxu0 %v3239_v46 }
 0x105   : > { %2670 = vmatprep.mubr.bf16.mxu0 %v3245_v56  ;;  %v2850_v56 = vld [vmem:[%s3899_s3 + $0x8] sm:$0xff]  }
 0x106   : > { %2680 = vmatprep.subr.bf16.mxu1 %v2850_v56 }
 0x107   : > { %2681 = vmatpush3.bf16.msra.mxu1 %v2850_v56 }
 0x108   : > { %2682 = vmatprep.subr.bf16.mxu1 %v2851_v13 }
 0x10b   : > { %2683 = vmatpush3.bf16.msra.mxu1 %v2851_v13 }
 0x10c   : > { %2671 = vmatmul.mubr.bf16.gmra.mrb[8].mxu0 %v3248_v59  ;;  %2684 = vmatprep.subr.bf16.mxu1 %v2852_v15 }
 0x10d   : > { %2674 = vmatprep.mubr.bf16.mxu0 %v3252_v63 }
 0x10f   : > { %2685 = vmatpush3.bf16.msra.mxu1 %v2852_v15 }
 0x110   : > { %2686 = vmatprep.subr.bf16.mxu1 %v2853_v60 }
 0x113   : > { %2687 = vmatpush3.bf16.msra.mxu1 %v2853_v60 }
 0x114   : > { %2675 = vmatmul.mubr.bf16.gmra.mrb[12].mxu0 %v3255_v0  ;;  %2688 = vmatprep.subr.bf16.mxu1 %v2854_v26 }
 0x117   : > { %2689 = vmatpush3.bf16.msra.mxu1 %v2854_v26 }
 0x118   : > { %2690 = vmatprep.subr.bf16.mxu1 %v2855_v27 }
 0x11b   : > { %2691 = vmatpush3.bf16.msra.mxu1 %v2855_v27 }
 0x11c   : > { %2692 = vmatprep.subr.bf16.mxu1 %v2856_v49 }
 0x11f   : > { %2693 = vmatpush3.bf16.msra.mxu1 %v2856_v49 }
 0x120   : > { %2710 = vmatprep.subr.bf16.mxu1 %v3904_v43 }
 0x178   : > { %v2536_v20 = vpop.f32.mrb[0].mxu1 }
 0x179   : > { %v585_v7 = vpop.f32.mrb[1].mxu1 }
 0x17a   : > { %v2537_v10 = vpop.f32.mrb[2].mxu1 }
 0x17b   : > { %v588_v33 = vpop.f32.mrb[3].mxu1 }
 0x180   : > { %v2540_v12 = vpop.f32.mrb[4].mxu1 }
 0x181   : > { %v601_v38 = vpop.f32.mrb[5].mxu1 }
 0x182   : > { %v3355_v51 = vpop.f32.mrb[6].mxu1 }
 0x183   : > { %v3357_v36 = vpop.f32.mrb[7].mxu1 }
 0x189   : > { %v3362_v46 = vpop.f32.mrb[8].mxu1 }
 0x18a   : > { %v3367_v59 = vpop.f32.mrb[9].mxu1 }
 0x18b   : > { %v3369_v63 = vpop.f32.mrb[10].mxu1 }
 0x18c   : > { %v3371_v0 = vpop.f32.mrb[11].mxu1 }
 0x191   : > { %v3376_v14 = vpop.f32.mrb[12].mxu1 }
 0x192   : > { %v3381_v21 = vpop.f32.mrb[13].mxu1 }
 0x193   : > { %v3383_v22 = vpop.f32.mrb[14].mxu1 }
 0x194   : > { %v3385_v23 = vpop.f32.mrb[15].mxu1 }
 0x1cf   : > { %v2664_v48 = vpop.f32.mrb[0].mxu0 }
 0x1d0   : > { %v2730_v57 = vadd.f32 %v2664_v48, %v2536_v20  ;;  %v1355_v1 = vpop.f32.mrb[1].mxu0 }
 0x1d1   : > { %v2731_v28 = vadd.f32 %v1355_v1, %v585_v7  ;;  %v2665_v30 = vpop.f32.mrb[2].mxu0 }
 0x1d2   : > { %v3406_v3 = vadd.f32 %v2730_v57, %v3403_v54  ;;  %v2732_v58 = vadd.f32 %v2665_v30, %v2537_v10  ;;  %v1358_v16 = vpop.f32.mrb[3].mxu0 }
 0x1d3   : > { %v3409_v31 = vadd.f32 %v2731_v28, %v3403_v54  ;;  %v2733_v24 = vadd.f32 %v1358_v16, %v588_v33 }
 0x1d4   : > { %v1475_v6 = vmul.f32 0.70710677, %v3406_v3  ;;  %v3413_v17 = vadd.f32 %v2732_v58, %v3403_v54 }
 0x1d5   : > { %v1473_v32 = vmul.f32 0.70710677, %v3409_v31  ;;  %v3422_v39 = vadd.f32 %v2733_v24, %v3403_v54 }
 0x1d6   : > { %v3416_v34 = vclamps-f32 %v1475_v6, 3.832507  ;;  %v1476_v35 = vmul.f32 0.70710677, %v3413_v17 }
 0x1d7   : > { %v3419_v37 = vclamps-f32 %v1473_v32, 3.832507  ;;  %v2668_v42 = vpop.f32.mrb[4].mxu0  ;;  %v1474_v19 = vmul.f32 0.70710677, %v3422_v39 }
 0x1d8   : > { %v3426_v18 = vmul.f32 %v3416_v34, %v3416_v34  ;;  %v3428_v25 = vclamps-f32 %v1476_v35, 3.832507  ;;  %v2734_v29 = vadd.f32 %v2668_v42, %v2540_v12  ;;  %v1371_v40 = vpop.f32.mrb[5].mxu0 }
 0x1d9   : > { %v2735_v53 = vadd.f32 %v1371_v40, %v601_v38  ;;  %v2669_v44 = vpop.f32.mrb[6].mxu0  ;;  %v3438_v55 = vmul.f32 %v3419_v37, %v3419_v37  ;;  %v3450_v10 = vclamps-f32 %v1474_v19, 3.832507 }
 0x1da   : > { %v1539_v47 = vmul.f32 0.00022905065, %v3426_v18  ;;  %v1667_v50 = vmul.f32 -1.1791603e-07, %v3426_v18  ;;  %v3434_v8 = vmul.f32 %v3428_v25, %v3428_v25  ;;  %v1374_v41 = vpop.f32.mrb[7].mxu0  ;;  %v2736_v62 = vadd.f32 %v2669_v44, %v3355_v51 }
 0x1db   : > { %v2737_v2 = vadd.f32 %v1374_v41, %v3357_v36  ;;  %v3446_v5 = vadd.f32 %v2734_v29, %v3403_v54  ;;  %v1537_v20 = vmul.f32 0.00022905065, %v3438_v55  ;;  %v3457_v15 = vadd.f32 %v2735_v53, %v3403_v54 }
 0x1dc   : > { %v1555_v9 = vadd.f32 0.003408291, %v1539_v47  ;;  %v1683_v52 = vadd.f32 2.3547966e-05, %v1667_v50  ;;  %v1540_v61 = vmul.f32 0.00022905065, %v3434_v8  ;;  %v3463_v49 = vmul.f32 %v3450_v10, %v3450_v10 }
 0x1dd   : > { %v1668_v4 = vmul.f32 -1.1791603e-07, %v3434_v8  ;;  %v1479_v36 = vmul.f32 0.70710677, %v3446_v5  ;;  %v1553_v26 = vadd.f32 0.003408291, %v1537_v20  ;;  %v3482_v47 = vadd.f32 %v2736_v62, %v3403_v54 }
 0x1de   : > { %v1699_v11 = vmul.f32 %v1683_v52, %v3426_v18  ;;  %v1571_v33 = vmul.f32 %v1555_v9, %v3426_v18  ;;  %v1556_v38 = vadd.f32 0.003408291, %v1540_v61  ;;  %v1477_v24 = vmul.f32 0.70710677, %v3457_v15 }
 0x1df   : > { %v1684_v7 = vadd.f32 2.3547966e-05, %v1668_v4  ;;  %v2672_v51 = vpop.f32.mrb[8].mxu0  ;;  %v3469_v58 = vclamps-f32 %v1479_v36, 3.832507  ;;  %v1569_v6 = vmul.f32 %v1553_v26, %v3438_v55  ;;  %v3503_v26 = vadd.f32 %v2737_v2, %v3403_v54 }
 0x1e0   : > { %v1715_v12 = vadd.f32 0.0010179626, %v1699_v11  ;;  %v1387_v56 = vpop.f32.mrb[9].mxu0  ;;  %v1587_v57 = vadd.f32 0.050955694, %v1571_v33  ;;  %v1572_v28 = vmul.f32 %v1556_v38, %v3434_v8 }
 0x1e1   : > { %v1700_v45 = vmul.f32 %v1684_v7, %v3434_v8  ;;  %v3459_v60 = vpop.f32.mrb[10].mxu0  ;;  %v1538_v35 = vmul.f32 0.00022905065, %v3463_v49  ;;  %v3479_v44 = vmul.f32 %v3469_v58, %v3469_v58  ;;  %v3485_v19 = vclamps-f32 %v1477_v24, 3.832507 }
 0x1e2   : > { %v1731_v13 = vmul.f32 %v1715_v12, %v3426_v18  ;;  %v3465_v48 = vpop.f32.mrb[11].mxu0  ;;  %v1603_v42 = vmul.f32 %v1587_v57, %v3426_v18  ;;  %v1588_v40 = vadd.f32 0.050955694, %v1572_v28  ;;  %v1585_v52 = vadd.f32 0.050955694, %v1569_v6 }
 0x1e3   : > { %v1716_v27 = vadd.f32 0.0010179626, %v1700_v45  ;;  %v1554_v4 = vadd.f32 0.003408291, %v1538_v35  ;;  %v1543_v62 = vmul.f32 0.00022905065, %v3479_v44 }
 0x1e4   : > { %v1747_v1 = vadd.f32 0.01407047, %v1731_v13  ;;  %v1619_v11 = vadd.f32 0.18520832, %v1603_v42  ;;  %v1604_v7 = vmul.f32 %v1588_v40, %v3434_v8  ;;  %v1480_v38 = vmul.f32 0.70710677, %v3482_v47 }
 0x1e5   : > { %v1732_v30 = vmul.f32 %v1716_v27, %v3434_v8  ;;  %v3500_v13 = vmul.f32 %v3485_v19, %v3485_v19  ;;  %v2738_v27 = vadd.f32 %v2672_v51, %v3362_v46  ;;  %v1559_v42 = vadd.f32 0.003408291, %v1543_v62 }
 0x1e6   : > { %v1763_v16 = vmul.f32 %v1747_v1, %v3426_v18  ;;  %v1570_v1 = vmul.f32 %v1554_v4, %v3463_v49  ;;  %v3507_v28 = vclamps-f32 %v1480_v38, 3.832507  ;;  %v1620_v6 = vadd.f32 0.18520832, %v1604_v7 }
 0x1e7   : > { %v1748_v32 = vadd.f32 0.01407047, %v1732_v30  ;;  %v2676_v50 = vpop.f32.mrb[12].mxu0  ;;  %v2739_v30 = vadd.f32 %v1387_v56, %v3367_v59  ;;  %v3518_v46 = vadd.f32 %v2738_v27, %v3403_v54  ;;  %v1541_v51 = vmul.f32 0.00022905065, %v3500_v13 }
 0x1e8   : > { %v1779_v29 = vadd.f32 0.11098505, %v1763_v16  ;;  %v3487_v9 = vpop.f32.mrb[13].mxu0  ;;  %v1635_v16 = vmul.f32 %v1619_v11, %v3426_v18  ;;  %v3515_v2 = vmul.f32 %v3507_v28, %v3507_v28  ;;  %v1601_v56 = vmul.f32 %v1585_v52, %v3438_v55 }
 0x1e9   : > { %v1764_v53 = vmul.f32 %v1748_v32, %v3434_v8  ;;  %v3490_v33 = vpop.f32.mrb[14].mxu0  ;;  %v1478_v32 = vmul.f32 0.70710677, %v3503_v26  ;;  %v1483_v4 = vmul.f32 0.70710677, %v3518_v46  ;;  %v1636_v11 = vmul.f32 %v1620_v6, %v3434_v8 }
 0x1ea   : > { %v1795_v41 = vmul.f32 %v1779_v29, %v3426_v18  ;;  %v3495_v45 = vpop.f32.mrb[15].mxu0  ;;  %v1544_v40 = vmul.f32 0.00022905065, %v3515_v2  ;;  %v2740_v38 = vadd.f32 %v3459_v60, %v3369_v63 }
 0x1eb   : > { %v1780_v61 = vadd.f32 0.11098505, %v1764_v53  ;;  %v3521_v59 = vclamps-f32 %v1478_v32, 3.832507  ;;  %v1651_v53 = vadd.f32 1.1283791, %v1635_v16 }
 0x1ec   : > { %v1811_v20 = vadd.f32 0.49746925, %v1795_v41  ;;  %v1586_v41 = vadd.f32 0.050955694, %v1570_v1  ;;  %v3537_v62 = vclamps-f32 %v1483_v4, 3.832507  ;;  %v2743_v4 = vadd.f32 %v3487_v9, %v3381_v21 }
 0x1ed   : > { %v1796_v12 = vmul.f32 %v1780_v61, %v3434_v8  ;;  %v3530_v61 = vmul.f32 %v3521_v59, %v3521_v59  ;;  %v1859_v63 = vmul.f32 %v3416_v34, %v1651_v53  ;;  %v1652_v60 = vadd.f32 1.1283791, %v1636_v11 }
 0x1ee   : > { %v1827_v36 = vmul.f32 %v1811_v20, %v3426_v18  ;;  %v3524_v18 = vadd.f32 %v2739_v30, %v3403_v54  ;;  %v1575_v20 = vmul.f32 %v1559_v42, %v3479_v44  ;;  %v1602_v1 = vmul.f32 %v1586_v41, %v3463_v49 }
 0x1ef   : > { %v1812_v57 = vadd.f32 0.49746925, %v1796_v12  ;;  %v1557_v12 = vadd.f32 0.003408291, %v1541_v51  ;;  %v1542_v52 = vmul.f32 0.00022905065, %v3530_v61  ;;  %v3549_v16 = vmul.f32 %v3537_v62, %v3537_v62 }
 0x1f0   : > { %v1843_v24 = vadd.f32 1.0, %v1827_v36  ;;  %v1481_v7 = vmul.f32 0.70710677, %v3524_v18  ;;  %v1560_v36 = vadd.f32 0.003408291, %v1544_v40 }
 0x1f1   : > { %v1828_v35 = vmul.f32 %v1812_v57, %v3434_v8  ;;  %v2741_v57 = vadd.f32 %v3465_v48, %v3371_v0  ;;  %v2742_v8 = vadd.f32 %v2676_v50, %v3376_v14  ;;  %v1558_v30 = vadd.f32 0.003408291, %v1542_v52 }
 0x1f2   : > { %2858 = vrcp.f32 %v1843_v24  ;;  %v3541_v27 = vclamps-f32 %v1481_v7, 3.832507  ;;  %v3552_v24 = vadd.f32 %v2740_v38, %v3403_v54  ;;  %v1591_v14 = vadd.f32 0.050955694, %v1575_v20 }
 0x1f3   : > { %v1844_v29 = vadd.f32 1.0, %v1828_v35  ;;  %v3560_v0 = vadd.f32 %v2741_v57, %v3403_v54  ;;  %v1573_v48 = vmul.f32 %v1557_v12, %v3500_v13  ;;  %v1547_v50 = vmul.f32 0.00022905065, %v3549_v16 }
 0x1f4   : > { %v3557_v6 = vmul.f32 %v3541_v27, %v3541_v27  ;;  %v1484_v32 = vmul.f32 0.70710677, %v3552_v24  ;;  %v1576_v35 = vmul.f32 %v1560_v36, %v3515_v2  ;;  %v1574_v42 = vmul.f32 %v1558_v30, %v3530_v61 }
 0x1f5   : > { %2860 = vrcp.f32 %v1844_v29  ;;  %v1482_v51 = vmul.f32 0.70710677, %v3560_v0  ;;  %v1617_v40 = vadd.f32 0.18520832, %v1601_v56  ;;  %v1563_v53 = vadd.f32 0.003408291, %v1547_v50 }
 0x1f6   : > { %v1545_v34 = vmul.f32 0.00022905065, %v3557_v6  ;;  %v3569_v41 = vclamps-f32 %v1484_v32, 3.832507  ;;  %v1860_v20 = vmul.f32 %v3428_v25, %v1652_v60  ;;  %v1607_v52 = vmul.f32 %v1591_v14, %v3479_v44 }
 0x1f7   : > { %v3574_v12 = vclamps-f32 %v1482_v51, 3.832507  ;;  %v1589_v38 = vadd.f32 0.050955694, %v1573_v48  ;;  %v1579_v36 = vmul.f32 %v1563_v53, %v3549_v16  ;;  %v1618_v30 = vadd.f32 0.18520832, %v1602_v1 }
 0x1f8   : > { %v1561_v7 = vadd.f32 0.003408291, %v1545_v34  ;;  %v3580_v56 = vmul.f32 %v3569_v41, %v3569_v41  ;;  %v1592_v50 = vadd.f32 0.050955694, %v1576_v35  ;;  %v1590_v32 = vadd.f32 0.050955694, %v1574_v42 }
 0x1f9   : > { %v3586_v60 = vmul.f32 %v3574_v12, %v3574_v12  ;;  %v1459_v14 = vmul.f32 0.5, %v3406_v3  ;;  %v3590_v48 = vmul.f32 0.5, %v3409_v31  ;;  %v1460_v34 = vmul.f32 0.5, %v3413_v17 }
 0x1fa   : > { %v1577_v21 = vmul.f32 %v1561_v7, %v3557_v6  ;;  %v1595_v1 = vadd.f32 0.050955694, %v1579_v36  ;;  %v1633_v35 = vmul.f32 %v1617_v40, %v3438_v55  ;;  %v1623_v51 = vadd.f32 0.18520832, %v1607_v52 }
 0x1fb   : > { %v1634_v53 = vmul.f32 %v1618_v30, %v3463_v49  ;;  %v1546_v17 = vmul.f32 0.00022905065, %v3586_v60  ;;  %v3604_v40 = vmul.f32 0.5, %v3422_v39  ;;  %v3611_v36 = vadd.f32 %v2743_v4, %v3403_v54 }
 0x1fc   : > { %v2859_v29 = vpop.eup %2858  ;;  %v1593_v7 = vadd.f32 0.050955694, %v1577_v21  ;;  %v1611_v52 = vmul.f32 %v1595_v1, %v3549_v16  ;;  %v1649_v30 = vadd.f32 1.1283791, %v1633_v35  ;;  %v2744_v4 = vadd.f32 %v3490_v33, %v3383_v22 }
 0x1fd   : > { %v1891_v11 = vmul.f32 %v2859_v29, %v1859_v63  ;;  %v1548_v63 = vmul.f32 0.00022905065, %v3580_v56  ;;  %v1605_v29 = vmul.f32 %v1589_v38, %v3500_v13  ;;  %v3608_v38 = vadd.f32 %v2742_v8, %v3403_v54  ;;  %3913 = vst [vmem:[#allocation3_spill] sm:$0xff] %v3611_v36 }
 0x1fe   : > { %v1627_v1 = vadd.f32 0.18520832, %v1611_v52 }
 0x1ff   : > { %v2861_v57 = vpop.eup %2860  ;;  %v1907_v9 = vadd.f32 1.0, %v1891_v11  ;;  %v1608_v11 = vmul.f32 %v1592_v50, %v3515_v2  ;;  %3912 = vst [vmem:[#allocation2_spill] sm:$0xff] %v3608_v38  ;;  %v1621_v21 = vadd.f32 0.18520832, %v1605_v29  ;;  %v1487_v35 = vmul.f32 0.70710677, %v3608_v38 }
 0x200   : > { %v1892_v25 = vmul.f32 %v2861_v57, %v1860_v20  ;;  %v1606_v20 = vmul.f32 %v1590_v32, %v3530_v61  ;;  %v1564_v57 = vadd.f32 0.003408291, %v1548_v63  ;;  %v1639_v32 = vmul.f32 %v1623_v51, %v3479_v44 }
 0x201   : > { %v3598_v3 = vmul.f32 %v1907_v9, %v1459_v14  ;;  %v1650_v9 = vadd.f32 1.1283791, %v1634_v53  ;;  %v1624_v39 = vadd.f32 0.18520832, %v1608_v11  ;;  %v1609_v63 = vmul.f32 %v1593_v7, %v3557_v6 }
 0x202   : > { %v1908_v42 = vadd.f32 1.0, %v1892_v25  ;;  %v3617_v25 = vmul.f32 0.5, %v3446_v5  ;;  %v1622_v14 = vadd.f32 0.18520832, %v1606_v20  ;;  %v1580_v8 = vmul.f32 %v1564_v57, %v3580_v56 }
 0x203   : > { %v2745_v51 = vadd.f32 %v3495_v45, %v3385_v23  ;;  %v3628_v5 = vmul.f32 %v3419_v37, %v1649_v30  ;;  %v1655_v29 = vadd.f32 1.1283791, %v1639_v32  ;;  %v3631_v53 = vmul.f32 0.5, %v3457_v15 }
 0x204   : > { %v3600_v31 = vmul.f32 %v1908_v42, %v1460_v34  ;;  %v1562_v34 = vadd.f32 0.003408291, %v1546_v17  ;;  %v1485_v42 = vmul.f32 0.70710677, %v3611_v36  ;;  %v1637_v11 = vmul.f32 %v1621_v21, %v3500_v13 }
 0x205   : > { %v3635_v20 = vmul.f32 0.5, %v3482_v47  ;;  %v1640_v22 = vmul.f32 %v1624_v39, %v3515_v2  ;;  %v1625_v33 = vadd.f32 0.18520832, %v1609_v63  ;;  %v3639_v7 = vadd.f32 %v2745_v51, %v3403_v54 }
 0x206   : > { %v3642_v23 = vmul.f32 %v3450_v10, %v1650_v9  ;;  %v1638_v37 = vmul.f32 %v1622_v14, %v3530_v61  ;;  %v1596_v45 = vadd.f32 0.050955694, %v1580_v8  ;;  %v1578_v15 = vmul.f32 %v1562_v34, %v3586_v60 }
 0x207   : > { %3914 = vst [vmem:[#allocation4_spill] sm:$0xff] %v3639_v7  ;;  %v3647_v57 = vmul.f32 0.5, %v3503_v26  ;;  %v1643_v47 = vmul.f32 %v1627_v1, %v3549_v16  ;;  %v3650_v17 = vclamps-f32 %v1487_v35, 3.832507  ;;  %v3652_v52 = vclamps-f32 %v1485_v42, 3.832507 }
 0x208   : > { %v3655_v30 = vmul.f32 %v3469_v58, %v1655_v29  ;;  %v1653_v32 = vadd.f32 1.1283791, %v1637_v11  ;;  %v3658_v10 = vmul.f32 0.5, %v3524_v18  ;;  %v3661_v21 = vadd.f32 %v2744_v4, %v3403_v54 }
 0x209   : > { %3915 = vst [vmem:[#allocation5_spill] sm:$0xff] %v3650_v17  ;;  %v1656_v9 = vadd.f32 1.1283791, %v1640_v22  ;;  %v1641_v26 = vmul.f32 %v1625_v33, %v3557_v6  ;;  %v3665_v39 = vmul.f32 0.5, %v3560_v0  ;;  %v1486_v63 = vmul.f32 0.70710677, %v3639_v7 }
 0x20a   : > { %3916 = vst [vmem:[#allocation6_spill] sm:$0xff] %v3661_v21  ;;  %v1654_v14 = vadd.f32 1.1283791, %v1638_v37  ;;  %v1612_v8 = vmul.f32 %v1596_v45, %v3580_v56  ;;  %v1594_v58 = vadd.f32 0.050955694, %v1578_v15  ;;  %v3672_v18 = vmul.f32 %v3650_v17, %v3650_v17 }
 0x20b   : > { %v1665_v34 = vmul.f32 -1.1791603e-07, %v3438_v55  ;;  %v1659_v1 = vadd.f32 1.1283791, %v1643_v47  ;;  %v3676_v54 = vmul.f32 %v3652_v52, %v3652_v52  ;;  %v1666_v0 = vmul.f32 -1.1791603e-07, %v3463_v49 }
 0x20c   : > { %v3680_v4 = vmul.f32 %v3485_v19, %v1653_v32  ;;  %v1488_v35 = vmul.f32 0.70710677, %v3661_v21  ;;  %v1669_v51 = vmul.f32 -1.1791603e-07, %v3500_v13  ;;  %v3685_v29 = vmul.f32 %v3507_v28, %v1656_v9 }
 0x20d   : > { %v1681_v42 = vadd.f32 2.3547966e-05, %v1665_v34  ;;  %v1657_v11 = vadd.f32 1.1283791, %v1641_v26  ;;  %v3687_v22 = vclamps-f32 %v1486_v63, 3.832507  ;;  %v1610_v45 = vmul.f32 %v1594_v58, %v3586_v60 }
 0x20e   : > { %v1682_v33 = vadd.f32 2.3547966e-05, %v1666_v0  ;;  %v1628_v37 = vadd.f32 0.18520832, %v1612_v8  ;;  %v1670_v19 = vmul.f32 -1.1791603e-07, %v3530_v61  ;;  %v3696_v28 = vmul.f32 %v3521_v59, %v1654_v14 }
 0x20f   : > { %v1697_v15 = vmul.f32 %v1681_v42, %v3438_v55  ;;  %v1551_v47 = vmul.f32 0.00022905065, %v3672_v18  ;;  %v1549_v32 = vmul.f32 0.00022905065, %v3676_v54  ;;  %v1685_v43 = vadd.f32 2.3547966e-05, %v1669_v51 }
 0x210   : > { %v1698_v34 = vmul.f32 %v1682_v33, %v3463_v49  ;;  %v3698_v9 = vclamps-f32 %v1488_v35, 3.832507  ;;  %v1686_v63 = vadd.f32 2.3547966e-05, %v1670_v19  ;;  %v3701_v8 = vmul.f32 %v3537_v62, %v1659_v1 }
 0x211   : > { %v1713_v26 = vadd.f32 0.0010179626, %v1697_v15  ;;  %v3705_v58 = vmul.f32 %v3687_v22, %v3687_v22  ;;  %v1701_v42 = vmul.f32 %v1685_v43, %v3500_v13  ;;  %v1644_v33 = vmul.f32 %v1628_v37, %v3580_v56 }
 0x212   : > { %3917 = vst [vmem:[#allocation7_spill] sm:$0xff] %v3698_v9  ;;  %v1714_v0 = vadd.f32 0.0010179626, %v1698_v34  ;;  %v1626_v51 = vadd.f32 0.18520832, %v1610_v45  ;;  %v1702_v14 = vmul.f32 %v1686_v63, %v3530_v61  ;;  %v3712_v35 = vmul.f32 %v3541_v27, %v1657_v11 }
 0x213   : > { %v1729_v59 = vmul.f32 %v1713_v26, %v3438_v55  ;;  %v1565_v15 = vadd.f32 0.003408291, %v1549_v32  ;;  %v1717_v1 = vadd.f32 0.0010179626, %v1701_v42  ;;  %v1567_v19 = vadd.f32 0.003408291, %v1551_v47 }
 0x214   : > { %v1730_v62 = vmul.f32 %v1714_v0, %v3463_v49  ;;  %v3717_v34 = vmul.f32 %v3698_v9, %v3698_v9  ;;  %v1718_v50 = vadd.f32 0.0010179626, %v1702_v14  ;;  %v1550_v37 = vmul.f32 0.00022905065, %v3705_v58 }
 0x215   : > { %v1745_v43 = vadd.f32 0.01407047, %v1729_v59  ;;  %v1733_v26 = vmul.f32 %v1717_v1, %v3500_v13  ;;  %v1671_v63 = vmul.f32 -1.1791603e-07, %v3479_v44  ;;  %v3722_v27 = vadd.f32 1.1283791, %v1644_v33 }
 0x216   : > { %v1746_v45 = vadd.f32 0.01407047, %v1730_v62  ;;  %v1642_v11 = vmul.f32 %v1626_v51, %v3586_v60  ;;  %v1734_v47 = vmul.f32 %v1718_v50, %v3530_v61  ;;  %v1581_v0 = vmul.f32 %v1565_v15, %v3676_v54 }
 0x217   : > { %v1761_v32 = vmul.f32 %v1745_v43, %v3438_v55  ;;  %v1749_v59 = vadd.f32 0.01407047, %v1733_v26  ;;  %v1672_v14 = vmul.f32 -1.1791603e-07, %v3515_v2  ;;  %v3731_v62 = vmul.f32 %v1567_v19, %v3672_v18 }
 0x218   : > { %v1762_v42 = vmul.f32 %v1746_v45, %v3463_v49  ;;  %v1552_v1 = vmul.f32 0.00022905065, %v3717_v34  ;;  %v1750_v21 = vadd.f32 0.01407047, %v1734_v47  ;;  %v1566_v38 = vadd.f32 0.003408291, %v1550_v37 }
 0x219   : > { %v1777_v33 = vadd.f32 0.11098505, %v1761_v32  ;;  %v1765_v43 = vmul.f32 %v1749_v59, %v3500_v13  ;;  %v1687_v9 = vadd.f32 2.3547966e-05, %v1671_v63  ;;  %v3735_v50 = vadd.f32 1.1283791, %v1642_v11 }
 0x21a   : > { %v1778_v51 = vadd.f32 0.11098505, %v1762_v42  ;;  %v1766_v45 = vmul.f32 %v1750_v21, %v3530_v61  ;;  %v1688_v26 = vadd.f32 2.3547966e-05, %v1672_v14  ;;  %v3739_v17 = vadd.f32 0.050955694, %v1581_v0 }
 0x21b   : > { %v1793_v15 = vmul.f32 %v1777_v33, %v3438_v55  ;;  %v1781_v7 = vadd.f32 0.11098505, %v1765_v43  ;;  %v1703_v32 = vmul.f32 %v1687_v9, %v3479_v44  ;;  %v3743_v47 = vadd.f32 0.003408291, %v1552_v1 }
 0x21c   : > { %v1794_v19 = vmul.f32 %v1778_v51, %v3463_v49  ;;  %v1782_v42 = vadd.f32 0.11098505, %v1766_v45  ;;  %v1704_v63 = vmul.f32 %v1688_v26, %v3515_v2  ;;  %v3747_v11 = vmul.f32 %v1566_v38, %v3705_v58 }
 0x21d   : > { %v1809_v37 = vadd.f32 0.49746925, %v1793_v15  ;;  %v1797_v21 = vmul.f32 %v1781_v7, %v3500_v13  ;;  %v1719_v14 = vadd.f32 0.0010179626, %v1703_v32  ;;  %v1673_v9 = vmul.f32 -1.1791603e-07, %v3557_v6 }
 0x21e   : > { %v1810_v59 = vadd.f32 0.49746925, %v1794_v19  ;;  %v1798_v33 = vmul.f32 %v1782_v42, %v3530_v61  ;;  %v1720_v51 = vadd.f32 0.0010179626, %v1704_v63  ;;  %v1674_v45 = vmul.f32 -1.1791603e-07, %v3586_v60 }
 0x21f   : > { %v1825_v0 = vmul.f32 %v1809_v37, %v3438_v55  ;;  %v1813_v43 = vadd.f32 0.49746925, %v1797_v21  ;;  %v1735_v15 = vmul.f32 %v1719_v14, %v3479_v44  ;;  %v1689_v7 = vadd.f32 2.3547966e-05, %v1673_v9 }
 0x220   : > { %v1826_v1 = vmul.f32 %v1810_v59, %v3463_v49  ;;  %v1814_v26 = vadd.f32 0.49746925, %v1798_v33  ;;  %v1736_v19 = vmul.f32 %v1720_v51, %v3515_v2  ;;  %v1690_v42 = vadd.f32 2.3547966e-05, %v1674_v45 }
 0x221   : > { %v1841_v38 = vadd.f32 1.0, %v1825_v0  ;;  %v1829_v55 = vmul.f32 %v1813_v43, %v3500_v13  ;;  %v1751_v37 = vadd.f32 0.01407047, %v1735_v15  ;;  %v1705_v49 = vmul.f32 %v1689_v7, %v3557_v6 }
 0x222   : > { %v1842_v32 = vadd.f32 1.0, %v1826_v1  ;;  %v1830_v63 = vmul.f32 %v1814_v26, %v3530_v61  ;;  %v1752_v36 = vadd.f32 0.01407047, %v1736_v19  ;;  %v1706_v14 = vmul.f32 %v1690_v42, %v3586_v60 }
 0x223   : > { %2862 = vrcp.f32 %v1841_v38  ;;  %v1845_v59 = vadd.f32 1.0, %v1829_v55  ;;  %v1767_v21 = vmul.f32 %v1751_v37, %v3479_v44  ;;  %v1721_v51 = vadd.f32 0.0010179626, %v1705_v49 }
 0x224   : > { %2864 = vrcp.f32 %v1842_v32  ;;  %v1846_v0 = vadd.f32 1.0, %v1830_v63  ;;  %v1768_v33 = vmul.f32 %v1752_v36, %v3515_v2  ;;  %v1675_v13 = vmul.f32 -1.1791603e-07, %v3549_v16 }
 0x225   : > { %2866 = vrcp.f32 %v1845_v59  ;;  %v1783_v9 = vadd.f32 0.11098505, %v1767_v21  ;;  %v1722_v1 = vadd.f32 0.0010179626, %v1706_v14  ;;  %v1676_v61 = vmul.f32 -1.1791603e-07, %v3580_v56 }
 0x226   : > { %2868 = vrcp.f32 %v1846_v0  ;;  %v1784_v43 = vadd.f32 0.11098505, %v1768_v33  ;;  %v1737_v15 = vmul.f32 %v1721_v51, %v3557_v6  ;;  %v1691_v45 = vadd.f32 2.3547966e-05, %v1675_v13 }
 0x227   : > { %v1799_v38 = vmul.f32 %v1783_v9, %v3479_v44  ;;  %v1738_v26 = vmul.f32 %v1722_v1, %v3586_v60  ;;  %v1692_v19 = vadd.f32 2.3547966e-05, %v1676_v61  ;;  %v1677_v36 = vmul.f32 -1.1791603e-07, %v3676_v54 }
 0x228   : > { %v1800_v7 = vmul.f32 %v1784_v43, %v3515_v2  ;;  %v1753_v32 = vadd.f32 0.01407047, %v1737_v15  ;;  %v1707_v55 = vmul.f32 %v1691_v45, %v3549_v16  ;;  %v1678_v37 = vmul.f32 -1.1791603e-07, %v3705_v58 }
 0x229   : > { %v1815_v42 = vadd.f32 0.49746925, %v1799_v38  ;;  %v1754_v63 = vadd.f32 0.01407047, %v1738_v26  ;;  %v1708_v49 = vmul.f32 %v1692_v19, %v3580_v56  ;;  %v1693_v59 = vadd.f32 2.3547966e-05, %v1677_v36 }
 0x22a   : > { %v1816_v21 = vadd.f32 0.49746925, %v1800_v7  ;;  %v1769_v14 = vmul.f32 %v1753_v32, %v3557_v6  ;;  %v1723_v0 = vadd.f32 0.0010179626, %v1707_v55  ;;  %v1694_v33 = vadd.f32 2.3547966e-05, %v1678_v37 }
 0x22b   : > { %v1831_v51 = vmul.f32 %v1815_v42, %v3479_v44  ;;  %v1770_v13 = vmul.f32 %v1754_v63, %v3586_v60  ;;  %v1724_v9 = vadd.f32 0.0010179626, %v1708_v49  ;;  %v1709_v1 = vmul.f32 %v1693_v59, %v3676_v54 }
 0x22c   : > { %v1832_v43 = vmul.f32 %v1816_v21, %v3515_v2  ;;  %v1785_v15 = vadd.f32 0.11098505, %v1769_v14  ;;  %v1739_v45 = vmul.f32 %v1723_v0, %v3549_v16  ;;  %v1710_v38 = vmul.f32 %v1694_v33, %v3705_v58 }
 0x22d   : > { %v2863_v61 = vpop.eup %2862  ;;  %v1847_v36 = vadd.f32 1.0, %v1831_v51  ;;  %v1786_v7 = vadd.f32 0.11098505, %v1770_v13  ;;  %v1740_v44 = vmul.f32 %v1724_v9, %v3580_v56 }
 0x22e   : > { %v2865_v26 = vpop.eup %2864  ;;  %v1889_v19 = vmul.f32 %v2863_v61, %v3628_v5  ;;  %v1848_v55 = vadd.f32 1.0, %v1832_v43  ;;  %v1801_v37 = vmul.f32 %v1785_v15, %v3557_v6  ;;  %v1755_v42 = vadd.f32 0.01407047, %v1739_v45 }
 0x22f   : > { %v1890_v32 = vmul.f32 %v2865_v26, %v3642_v23  ;;  %v2867_v63 = vpop.eup %2866  ;;  %2870 = vrcp.f32 %v1847_v36  ;;  %v1802_v49 = vmul.f32 %v1786_v7, %v3586_v60  ;;  %v1756_v59 = vadd.f32 0.01407047, %v1740_v44 }
 0x230   : > { %v1905_v2 = vadd.f32 1.0, %v1889_v19  ;;  %v2869_v21 = vpop.eup %2868  ;;  %v1893_v5 = vmul.f32 %v2867_v63, %v3680_v4  ;;  %2872 = vrcp.f32 %v1848_v55  ;;  %v1817_v0 = vadd.f32 0.49746925, %v1801_v37 }
 0x231   : > { %v1906_v14 = vadd.f32 1.0, %v1890_v32  ;;  %v1894_v23 = vmul.f32 %v2869_v21, %v3696_v28  ;;  %v1818_v51 = vadd.f32 0.49746925, %v1802_v49  ;;  %v1771_v13 = vmul.f32 %v1755_v42, %v3549_v16 }
 0x232   : > { %v1921_v33 = vmul.f32 %v1905_v2, %v3590_v48  ;;  %v1909_v61 = vadd.f32 1.0, %v1893_v5  ;;  %v1833_v43 = vmul.f32 %v1817_v0, %v3557_v6  ;;  %v1772_v15 = vmul.f32 %v1756_v59, %v3580_v56 }
 0x233   : > { %v1922_v9 = vmul.f32 %v1906_v14, %v3604_v40  ;;  %v1910_v45 = vadd.f32 1.0, %v1894_v23  ;;  %v1834_v26 = vmul.f32 %v1818_v51, %v3586_v60  ;;  %v1787_v4 = vadd.f32 0.11098505, %v1771_v13 }
 0x234   : > { %v1725_v19 = vadd.f32 0.0010179626, %v1709_v1  ;;  %v1925_v48 = vmul.f32 %v1909_v61, %v3631_v53  ;;  %v1849_v7 = vadd.f32 1.0, %v1833_v43  ;;  %v1788_v28 = vadd.f32 0.11098505, %v1772_v15 }
 0x235   : > { %v1937_v36 = vpack.c.bf16 %v1922_v9, %v1921_v33  ;;  %v1926_v44 = vmul.f32 %v1910_v45, %v3647_v57  ;;  %v1850_v32 = vadd.f32 1.0, %v1834_v26  ;;  %v1803_v40 = vmul.f32 %v1787_v4, %v3549_v16 }
 0x236   : > { %v1726_v55 = vadd.f32 0.0010179626, %v1710_v38  ;;  %2874 = vrcp.f32 %v1849_v7  ;;  %v1804_v6 = vmul.f32 %v1788_v28, %v3580_v56  ;;  %v1741_v37 = vmul.f32 %v1725_v19, %v3676_v54 }
 0x237   : > { %2694 = vmatprep.mubr.bf16.mxu1 %v1937_v36  ;;  %v1679_v60 = vmul.f32 -1.1791603e-07, %v3672_v18  ;;  %v3918_v1 = vpack.c.bf16 %v3600_v31, %v3598_v3  ;;  %v1939_v53 = vpack.c.bf16 %v1926_v44, %v1925_v48  ;;  %2876 = vrcp.f32 %v1850_v32 }
 0x238   : > { %v1819_v42 = vadd.f32 0.49746925, %v1803_v40  ;;  %v1742_v57 = vmul.f32 %v1726_v55, %v3705_v58  ;;  %v1866_v38 = vmul.f32 %v3574_v12, %v3735_v50  ;;  %v1820_v63 = vadd.f32 0.49746925, %v1804_v6 }
 0x239   : > { %2695 = vmatmul.mubr.bf16.vlgmr.msra.gmra.mrb[16].mxu1 %v3918_v1  ;;  %v1757_v2 = vadd.f32 0.01407047, %v1741_v37  ;;  %v1680_v49 = vmul.f32 -1.1791603e-07, %v3717_v34  ;;  %v2871_v59 = vpop.eup %2870  ;;  %v1598_v21 = vadd.f32 0.050955694, %v3747_v11  ;;  %v1584_v28 = vmul.f32 %v3743_v47, %v3717_v34 }
 0x23a   : > { %2698 = vmatprep.mubr.bf16.mxu1 %v1939_v53  ;;  %v1835_v14 = vmul.f32 %v1819_v42, %v3549_v16  ;;  %v1758_v3 = vadd.f32 0.01407047, %v1742_v57  ;;  %v1695_v31 = vadd.f32 2.3547966e-05, %v1679_v60  ;;  %v2873_v5 = vpop.eup %2872  ;;  %v1895_v0 = vmul.f32 %v2871_v59, %v3655_v30 }
 0x23b   : > { %v1836_v33 = vmul.f32 %v1820_v63, %v3580_v56  ;;  %v1773_v23 = vmul.f32 %v1757_v2, %v3676_v54  ;;  %v1696_v12 = vadd.f32 2.3547966e-05, %v1680_v49  ;;  %v1896_v50 = vmul.f32 %v2873_v5, %v3685_v29 }
 0x23c   : > { %v1851_v51 = vadd.f32 1.0, %v1835_v14  ;;  %v1774_v13 = vmul.f32 %v1758_v3, %v3705_v58  ;;  %v1711_v11 = vmul.f32 %v1695_v31, %v3672_v18  ;;  %v1911_v9 = vadd.f32 1.0, %v1895_v0 }
 0x23d   : > { %v1852_v61 = vadd.f32 1.0, %v1836_v33  ;;  %v1789_v16 = vadd.f32 0.11098505, %v1773_v23  ;;  %v1712_v43 = vmul.f32 %v1696_v12, %v3717_v34  ;;  %v1912_v15 = vadd.f32 1.0, %v1896_v50 }
 0x23e   : > { %2878 = vrcp.f32 %v1851_v51  ;;  %v1790_v30 = vadd.f32 0.11098505, %v1774_v13  ;;  %v1727_v45 = vadd.f32 0.0010179626, %v1711_v11  ;;  %v1613_v56 = vmul.f32 %v3739_v17, %v3676_v54 }
 0x23f   : > { %2880 = vrcp.f32 %v1852_v61  ;;  %v1805_v29 = vmul.f32 %v1789_v16, %v3676_v54  ;;  %v1728_v26 = vadd.f32 0.0010179626, %v1712_v43  ;;  %v1927_v4 = vmul.f32 %v1911_v9, %v3617_v25 }
 0x240   : > { %v1928_v19 = vmul.f32 %v1912_v15, %v3635_v20  ;;  %v1806_v36 = vmul.f32 %v1790_v30, %v3705_v58  ;;  %v1743_v48 = vmul.f32 %v1727_v45, %v3672_v18  ;;  %v2875_v7 = vpop.eup %2874  ;;  %v1614_v44 = vmul.f32 %v1598_v21, %v3705_v58 }
 0x241   : > { %v1821_v32 = vadd.f32 0.49746925, %v1805_v29  ;;  %v1744_v17 = vmul.f32 %v1728_v26, %v3717_v34  ;;  %v2877_v40 = vpop.eup %2876  ;;  %v1897_v6 = vmul.f32 %v2875_v7, %v3712_v35  ;;  %v1599_v20 = vadd.f32 0.050955694, %v3731_v62 }
 0x242   : > { %v1940_v55 = vpack.c.bf16 %v1928_v19, %v1927_v4  ;;  %v1822_v25 = vadd.f32 0.49746925, %v1806_v36  ;;  %v1759_v37 = vadd.f32 0.01407047, %v1743_v48  ;;  %v1898_v60 = vmul.f32 %v2877_v40, %v1866_v38 }
 0x243   : > { %v1837_v1 = vmul.f32 %v1821_v32, %v3676_v54  ;;  %v1760_v53 = vadd.f32 0.01407047, %v1744_v17  ;;  %v1629_v42 = vadd.f32 0.18520832, %v1613_v56  ;;  %v1913_v47 = vadd.f32 1.0, %v1897_v6  ;;  %v3919_v6 = vld [vmem:[#allocation3_spill] sm:$0xff] }
 0x244   : > { %2699 = vmatmul.mubr.bf16.gmra.mrb[20].mxu1 %v1940_v55  ;;  %v1838_v57 = vmul.f32 %v1822_v25, %v3705_v58  ;;  %v1775_v63 = vmul.f32 %v1759_v37, %v3672_v18  ;;  %v1630_v2 = vadd.f32 0.18520832, %v1614_v44  ;;  %v1914_v49 = vadd.f32 1.0, %v1898_v60  ;;  %v3920_v37 = vld [vmem:[#allocation4_spill] sm:$0xff] }
 0x245   : > { %v1853_v59 = vadd.f32 1.0, %v1837_v1  ;;  %v1776_v35 = vmul.f32 %v1760_v53, %v3717_v34  ;;  %v1868_v21 = vmul.f32 %v3569_v41, %v3722_v27  ;;  %v1600_v62 = vadd.f32 0.050955694, %v1584_v28 }
 0x246   : > { %v1854_v38 = vadd.f32 1.0, %v1838_v57  ;;  %v1791_v14 = vadd.f32 0.11098505, %v1775_v63  ;;  %v1929_v3 = vmul.f32 %v1913_v47, %v3658_v10  ;;  %v1930_v31 = vmul.f32 %v1914_v49, %v3665_v39  ;;  %v3922_v57 = vld [vmem:[#allocation7_spill] sm:$0xff] }
 0x247   : > { %2882 = vrcp.f32 %v1853_v59  ;;  %v1792_v5 = vadd.f32 0.11098505, %v1776_v35  ;;  %v1615_v33 = vmul.f32 %v1599_v20, %v3672_v18  ;;  %v1645_v23 = vmul.f32 %v1629_v42, %v3676_v54  ;;  %v3923_v35 = vld [vmem:[#allocation2_spill] sm:$0xff] }
 0x248   : > { %v2879_v0 = vpop.eup %2878  ;;  %2884 = vrcp.f32 %v1854_v38  ;;  %v1807_v12 = vmul.f32 %v1791_v14, %v3672_v18  ;;  %v1646_v41 = vmul.f32 %v1630_v2, %v3705_v58  ;;  %v1941_v27 = vpack.c.bf16 %v1930_v31, %v1929_v3 }
 0x249   : > { %v2881_v50 = vpop.eup %2880  ;;  %v1899_v51 = vmul.f32 %v2879_v0, %v3701_v8  ;;  %v1808_v10 = vmul.f32 %v1792_v5, %v3717_v34  ;;  %v1616_v39 = vmul.f32 %v1600_v62, %v3717_v34  ;;  %v1467_v9 = vmul.f32 0.5, %v3518_v46  ;;  %v3924_v62 = vld [vmem:[#allocation6_spill] sm:$0xff] }
 0x24a   : > { %v1900_v13 = vmul.f32 %v2881_v50, %v1868_v21  ;;  %v1823_v11 = vadd.f32 0.49746925, %v1807_v12  ;;  %2702 = vmatprep.mubr.bf16.mxu1 %v1941_v27  ;;  %v1468_v16 = vmul.f32 0.5, %v3552_v24  ;;  %v1661_v43 = vadd.f32 1.1283791, %v1645_v23 }
 0x24b   : > { %v1915_v61 = vadd.f32 1.0, %v1899_v51  ;;  %v1824_v54 = vadd.f32 0.49746925, %v1808_v10  ;;  %v1631_v30 = vadd.f32 0.18520832, %v1615_v33  ;;  %v1469_v25 = vmul.f32 0.5, %v3919_v6 }
 0x24c   : > { %v1916_v15 = vadd.f32 1.0, %v1900_v13  ;;  %v1839_v58 = vmul.f32 %v1823_v11, %v3672_v18  ;;  %v1662_v45 = vadd.f32 1.1283791, %v1646_v41  ;;  %v1632_v56 = vadd.f32 0.18520832, %v1616_v39 }
 0x24d   : > { %v1840_v8 = vmul.f32 %v1824_v54, %v3717_v34  ;;  %v1931_v29 = vmul.f32 %v1915_v61, %v1467_v9  ;;  %v1869_v46 = vmul.f32 %v3652_v52, %v1661_v43  ;;  %v1647_v24 = vmul.f32 %v1631_v30, %v3672_v18  ;;  %v3921_v18 = vld [vmem:[#allocation5_spill] sm:$0xff]  ;;  %v3861_v33 = vld [vmem:[%s3900_s4] ss:$0 sm:$0xff] }
 0x24e   : > { %v1932_v26 = vmul.f32 %v1916_v15, %v1468_v16  ;;  %v1855_v4 = vadd.f32 1.0, %v1839_v58  ;;  %v1870_v7 = vmul.f32 %v3687_v22, %v1662_v45  ;;  %v1648_v44 = vmul.f32 %v1632_v56, %v3717_v34 }
 0x24f   : > { %v1856_v19 = vadd.f32 1.0, %v1840_v8  ;;  %v1663_v55 = vadd.f32 1.1283791, %v1647_v24  ;;  %v1470_v52 = vmul.f32 0.5, %v3920_v37  ;;  %v1471_v21 = vmul.f32 0.5, %v3923_v35 }
 0x250   : > { %v1942_v36 = vpack.c.bf16 %v1932_v26, %v1931_v29  ;;  %2886 = vrcp.f32 %v1855_v4  ;;  %v1664_v60 = vadd.f32 1.1283791, %v1648_v44  ;;  %v1472_v38 = vmul.f32 0.5, %v3924_v62  ;;  %v2857_v62 = vld [vmem:[%s3901_s5] sm:$0xff]  }
 0x251   : > { %v2883_v48 = vpop.eup %2882  ;;  %2888 = vrcp.f32 %v1856_v19  ;;  %v1871_v42 = vmul.f32 %v3921_v18, %v1663_v55  ;;  %v3925_v0 = vmov 0.0  }
 0x252   : > { %v2885_v28 = vpop.eup %2884  ;;  %2703 = vmatmul.mubr.bf16.gmra.mrb[24].mxu1 %v1942_v36  ;;  %v1901_v32 = vmul.f32 %v2883_v48, %v1869_v46  ;;  %v1872_v63 = vmul.f32 %v3922_v57, %v1664_v60 }
 0x253   : > { %v1902_v17 = vmul.f32 %v2885_v28, %v1870_v7 }
 0x254   : > { %v1917_v40 = vadd.f32 1.0, %v1901_v32 }
 0x255   : > { %v1918_v20 = vadd.f32 1.0, %v1902_v17 }
 0x256   : > { %v1933_v1 = vmul.f32 %v1917_v40, %v1469_v25 }
 0x257   : > { %v1934_v53 = vmul.f32 %v1918_v20, %v1470_v52 }
 0x259   : > { %v1943_v22 = vpack.c.bf16 %v1934_v53, %v1933_v1 }
 0x25a   : > { %v2887_v47 = vpop.eup %2886 }
 0x25b   : > { %v2889_v34 = vpop.eup %2888  ;;  %2706 = vmatprep.mubr.bf16.mxu1 %v1943_v22  ;;  %v1903_v2 = vmul.f32 %v2887_v47, %v1871_v42 }
 0x25c   : > { %v1904_v49 = vmul.f32 %v2889_v34, %v1872_v63 }
 0x25d   : > { %v1919_v59 = vadd.f32 1.0, %v1903_v2 }
 0x25e   : > { %v1920_v14 = vadd.f32 1.0, %v1904_v49 }
 0x25f   : > { %v1935_v3 = vmul.f32 %v1919_v59, %v1471_v21 }
 0x260   : > { %v1936_v31 = vmul.f32 %v1920_v14, %v1472_v38  ;;  %v2144_v38 = vpop.permute.xlu1 %2143 }
 0x262   : > { %v1944_v5 = vpack.c.bf16 %v1936_v31, %v1935_v3 }
 0x264   : > { %2707 = vmatmul.mubr.bf16.gmra.mrb[28].mxu1 %v1944_v5  ;;  %v2149_v5 = vpop.permute.xlu0 %2148 }
 0x265   : > { %2726 = vmatprep.mubr.msk.bf16.mxu1 %vm2933_vm13, %v3925_v0 }
 0x30c   : > { %v2696_v23 = vpop.f32.mrb[16].mxu1 }
 0x30d   : > { %v2059_v12 = vadd.f32 %v2696_v23, %v3861_v33  ;;  %v2050_v50 = vpop.f32.mrb[17].mxu1 }
 0x30e   : > { %v2051_v41 = vadd.f32 %v3861_v33, %v2050_v50  ;;  %v2697_v27 = vpop.f32.mrb[18].mxu1 }
 0x30f   : > { %2890 = vtanh.f32 %v2059_v12  ;;  %v2062_v51 = vadd.f32 %v2697_v27, %v3861_v33  ;;  %v2053_v10 = vpop.f32.mrb[19].mxu1 }
 0x310   : > { %2892 = vtanh.f32 %v2051_v41  ;;  %v2054_v39 = vadd.f32 %v3861_v33, %v2053_v10 }
 0x311   : > { %2894 = vtanh.f32 %v2062_v51 }
 0x312   : > { %2896 = vtanh.f32 %v2054_v39 }
 0x317   : > { %v2700_v13 = vpop.f32.mrb[20].mxu1 }
 0x318   : > { %v2075_v9 = vadd.f32 %v2700_v13, %v3861_v33  ;;  %v2066_v61 = vpop.f32.mrb[21].mxu1 }
 0x319   : > { %v2891_v11 = vpop.eup %2890  ;;  %v2067_v16 = vadd.f32 %v3861_v33, %v2066_v61  ;;  %v2701_v43 = vpop.f32.mrb[22].mxu1 }
 0x31a   : > { %v2893_v54 = vpop.eup %2892  ;;  %2898 = vtanh.f32 %v2075_v9  ;;  %v2078_v58 = vadd.f32 %v2701_v43, %v3861_v33  ;;  %v2069_v30 = vpop.f32.mrb[23].mxu1 }
 0x31b   : > { %v2895_v15 = vpop.eup %2894  ;;  %2900 = vtanh.f32 %v2067_v16  ;;  %v2070_v8 = vadd.f32 %v3861_v33, %v2069_v30 }
 0x31c   : > { %v2897_v45 = vpop.eup %2896  ;;  %v2132_v56 = vpack.c.bf16 %v2895_v15, %v2891_v11  ;;  %2902 = vtanh.f32 %v2078_v58 }
 0x31d   : > { %v2131_v29 = vpack.c.bf16 %v2897_v45, %v2893_v54  ;;  %2904 = vtanh.f32 %v2070_v8 }
 0x31f   : > { %2711 = vmatpush3.bf16.xpose.msra.mxu1 %v2131_v29 }
 0x320   : > { %2712 = vmatprep.subr.bf16.mxu1 %v3925_v0 }
 0x324   : > { %v2899_v26 = vpop.eup %2898 }
 0x325   : > { %v2901_v4 = vpop.eup %2900  ;;  %v2704_v19 = vpop.f32.mrb[24].mxu1 }
 0x326   : > { %v2903_v46 = vpop.eup %2902  ;;  %v2091_v36 = vadd.f32 %v2704_v19, %v3861_v33  ;;  %v2082_v48 = vpop.f32.mrb[25].mxu1 }
 0x327   : > { %2713 = vmatpush3.bf16.xpose.msra.mxu1 %v2132_v56  ;;  %v2905_v24 = vpop.eup %2904  ;;  %v2083_v7 = vadd.f32 %v3861_v33, %v2082_v48  ;;  %v2705_v28 = vpop.f32.mrb[26].mxu1  ;;  %v2134_v44 = vpack.c.bf16 %v2903_v46, %v2899_v26 }
 0x328   : > { %2714 = vmatprep.subr.bf16.mxu1 %v3925_v0  ;;  %2906 = vtanh.f32 %v2091_v36  ;;  %v2094_v32 = vadd.f32 %v2705_v28, %v3861_v33  ;;  %v2085_v17 = vpop.f32.mrb[27].mxu1  ;;  %v2133_v40 = vpack.c.bf16 %v2905_v24, %v2901_v4 }
 0x329   : > { %2908 = vtanh.f32 %v2083_v7  ;;  %v2086_v55 = vadd.f32 %v3861_v33, %v2085_v17 }
 0x32a   : > { %2910 = vtanh.f32 %v2094_v32 }
 0x32b   : > { %2912 = vtanh.f32 %v2086_v55 }
 0x32f   : > { %2715 = vmatpush3.bf16.xpose.msra.mxu1 %v2133_v40 }
 0x330   : > { %2716 = vmatprep.subr.bf16.mxu1 %v3925_v0 }
 0x332   : > { %v2907_v6 = vpop.eup %2906 }
 0x333   : > { %v2909_v25 = vpop.eup %2908 }
 0x334   : > { %v2911_v37 = vpop.eup %2910 }
 0x335   : > { %v2913_v52 = vpop.eup %2912  ;;  %v2136_v20 = vpack.c.bf16 %v2911_v37, %v2907_v6 }
 0x336   : > { %v2135_v60 = vpack.c.bf16 %v2913_v52, %v2909_v25 }
 0x337   : > { %2717 = vmatpush3.bf16.xpose.msra.mxu1 %v2134_v44  ;;  %v2708_v1 = vpop.f32.mrb[28].mxu1 }
 0x338   : > { %2718 = vmatprep.subr.bf16.mxu1 %v3925_v0  ;;  %v2107_v53 = vadd.f32 %v2708_v1, %v3861_v33  ;;  %v2098_v18 = vpop.f32.mrb[29].mxu1 }
 0x339   : > { %v2099_v42 = vadd.f32 %v3861_v33, %v2098_v18  ;;  %v2709_v22 = vpop.f32.mrb[30].mxu1 }
 0x33a   : > { %2914 = vtanh.f32 %v2107_v53  ;;  %v2110_v47 = vadd.f32 %v2709_v22, %v3861_v33  ;;  %v2101_v57 = vpop.f32.mrb[31].mxu1 }
 0x33b   : > { %2916 = vtanh.f32 %v2099_v42  ;;  %v2102_v63 = vadd.f32 %v3861_v33, %v2101_v57 }
 0x33c   : > { %2918 = vtanh.f32 %v2110_v47 }
 0x33d   : > { %2920 = vtanh.f32 %v2102_v63 }
 0x33f   : > { %2719 = vmatpush3.bf16.xpose.msra.mxu1 %v2135_v60 }
 0x340   : > { %2720 = vmatprep.subr.bf16.mxu1 %v3925_v0 }
 0x344   : > { %v2915_v34 = vpop.eup %2914 }
 0x345   : > { %v2917_v2 = vpop.eup %2916 }
 0x346   : > { %v2919_v49 = vpop.eup %2918 }
 0x347   : > { %2721 = vmatpush3.bf16.xpose.msra.mxu1 %v2136_v20  ;;  %v2921_v59 = vpop.eup %2920  ;;  %v2138_v35 = vpack.c.bf16 %v2919_v49, %v2915_v34 }
 0x348   : > { %2722 = vmatprep.subr.bf16.mxu1 %v3925_v0  ;;  %v2137_v21 = vpack.c.bf16 %v2921_v59, %v2917_v2 }
 0x34f   : > { %2723 = vmatpush3.bf16.xpose.msra.mxu1 %v2137_v21 }
 0x350   : > { %2724 = vmatprep.subr.bf16.mxu1 %v3925_v0 }
 0x357   : > { %2725 = vmatpush3.bf16.xpose.msra.mxu1 %v2138_v35 }
 0x35e   : > { %2727 = vmatmul.mubr.bf16.vlgmr.msra.gmra.mrb[32].mxu1 %v2857_v62 }
 0x431   : > { %v2191_v14 = vpop.f32.mrb[32].mxu1 }
 0x432   : > { %v2192_v3 = vadd.f32 %v2191_v14, %v2144_v38  ;;  %v2728_v31 = vpop.f32.mrb[33].mxu1 }
 0x433   : > { %v2194_v33 = vpop.f32.mrb[34].mxu1 }
 0x434   : > { %2198 = vst [vmem:[%s278_s11] sm:$0xff] %v2192_v3  ;;  %v2195_v23 = vadd.f32 %v2194_v33, %v2149_v5  ;;  %v2729_v0 = vpop.f32.mrb[35].mxu1 }
 0x436   : > { %2199 = vst [vmem:[%s278_s11 + $0x8] sm:$0xff] %v2195_v23 }
 0x437 PF: > { %s17_s24 = sadd.s32 1, %s2928_s24  }
 0x438   : > { %p14_p4 = scmp.ge.s32.totalorder %s17_s24, 4  }
 0x43a   :  { %16 = sbr.rel (!%p14_p4) target bundleno = 1 (0x1), region = 82 }

</bundles_post_ra>
